<compile_context>
chip_gen: v7x
topology: tpu7x:2x2x1
jax: 0.10.0
libtpu: 0.0.40
codegen_flags: <defaults>
</compile_context>

<pallas_src>
import math
import functools

import jax
import jax.numpy as jnp
from jax.experimental import pallas as pl
from jax.experimental.pallas import tpu as pltpu


def _rgbm_fuse_kernel(rgb_ref, mask_ref,
                      wqkv_ref, wo_ref,
                      bqkv_ref, bo_ref,
                      gamma_ref, beta_ref,
                      out_ref,
                      *, heads: int, eps: float):
    Bc, Lq, E = rgb_ref.shape
    _, Lk, _ = mask_ref.shape
    hd = E // heads
    nq = Bc * Lq
    nk = Bc * Lk

    # Flatten batch*seq into the matmul M dimension (leading-dim merge, free).
    rgb2 = rgb_ref[...].reshape(nq, E)          # kept in input dtype for residual
    msk2 = mask_ref[...].reshape(nk, E)

    # ---- fused Q|K|V projection (bf16 MXU operands, f32 accumulation) ---------
    if nq + nk <= 256:
        # Small M: one MXU issue with a 3E-lane-dense output.  The cross terms
        # (mask rows x Wq, rgb rows x Wk|Wv) are computed and discarded — free at
        # this size because everything fits in a single MXU pass anyway.
        x_bf = jnp.concatenate([rgb2, msk2], axis=0).astype(jnp.bfloat16)
        qkv = jnp.dot(x_bf, wqkv_ref[...],
                      preferred_element_type=jnp.float32) + bqkv_ref[...]
        q2 = qkv[:nq, :E]                        # (nq, E)
        kv2 = qkv[nq:, E:]                       # (nk, 2E)
    else:
        # Large M: skip the wasted cross-term FLOPs.
        q2 = jnp.dot(rgb2.astype(jnp.bfloat16), wqkv_ref[:, :E],
                     preferred_element_type=jnp.float32) + bqkv_ref[:, :E]
        kv2 = jnp.dot(msk2.astype(jnp.bfloat16), wqkv_ref[:, E:],
                      preferred_element_type=jnp.float32) + bqkv_ref[:, E:]

    q3 = q2.reshape(Bc, Lq, E)           # 1/sqrt(hd) already folded into Wq / bq
    kv3 = kv2.reshape(Bc, Lk, 2 * E)     # [..., :E] = K, [..., E:] = V

    # ---- per-head attention (scores/softmax/PV), outputs collected once -------
    o_heads = []
    for h in range(heads):
        qh = q3[:, :, h * hd:(h + 1) * hd].astype(jnp.bfloat16)          # (Bc,Lq,hd)
        kh = kv3[:, :, h * hd:(h + 1) * hd].astype(jnp.bfloat16)         # (Bc,Lk,hd)
        vh = kv3[:, :, E + h * hd:E + (h + 1) * hd].astype(jnp.bfloat16)

        s = jnp.einsum('bqd,bkd->bqk', qh, kh,
                       preferred_element_type=jnp.float32)               # (Bc,Lq,Lk)
        # exact softmax in f32 (EUP/VPU are nowhere near the bottleneck)
        s = s - jnp.max(s, axis=-1, keepdims=True)
        p = jnp.exp(s)
        p = p / jnp.sum(p, axis=-1, keepdims=True)
        oh = jnp.einsum('bqk,bkd->bqd', p.astype(jnp.bfloat16), vh,
                        preferred_element_type=jnp.float32)              # (Bc,Lq,hd)
        o_heads.append(oh)

    # Head order is lane-contiguous: one concat, then a single K=E out-projection.
    o2 = jnp.concatenate(o_heads, axis=-1).reshape(nq, E)

    proj = jnp.dot(o2.astype(jnp.bfloat16), wo_ref[...],
                   preferred_element_type=jnp.float32) + bo_ref[...]

    # ---- residual + LayerNorm (f32, biased variance, affine) ------------------
    y = rgb2.astype(jnp.float32) + proj
    mu = jnp.mean(y, axis=-1, keepdims=True)
    var = jnp.mean((y - mu) * (y - mu), axis=-1, keepdims=True)
    normed = (y - mu) * jax.lax.rsqrt(var + eps)
    out = normed * gamma_ref[...] + beta_ref[...]
    out_ref[...] = out.reshape(Bc, Lq, E).astype(out_ref.dtype)


def _default_num_chunks(batch: int, rows_per_batch: int) -> int:
    """Split across the two v7x TensorCores only when there is enough work."""
    try:
        kind = jax.devices()[0].device_kind.lower()
    except Exception:  # pragma: no cover
        kind = ""
    dual_tc = ("v7" in kind) or ("tpu7" in kind)
    if dual_tc and batch >= 2 and batch % 2 == 0:
        # Per-core M must amortize the ~0.35 us grid-step overhead and the
        # duplicated weight DMA into both cores' VMEM.
        if (batch // 2) * rows_per_batch >= 128:
            return 2
    return 1


def rgbm_fuse(rgb, mask, params, *, heads: int, eps: float = 1e-5,
              num_chunks: int | None = None):
    """rgb: (B, Lq, E), mask: (B, Lk, E) -> (B, Lq, E)."""
    B, Lq, E = rgb.shape
    _, Lk, _ = mask.shape
    assert E % heads == 0, "heads must divide the embedding dim"
    hd = E // heads
    scale = 1.0 / math.sqrt(hd)

    if num_chunks is None:
        num_chunks = _default_num_chunks(B, Lq)
    assert B % num_chunks == 0, "batch must divide the number of grid chunks"
    Bc = B // num_chunks

    # Trace-time weight prep (free): x @ W layout, attention scale folded into
    # Wq / bq, Q|K|V fused, matmul operands cast to bf16 (biases / LN stay f32).
    wqkv = jnp.concatenate(
        [params["wq"].T * scale, params["wk"].T, params["wv"].T], axis=1
    ).astype(jnp.bfloat16)                                          # (E, 3E)
    bqkv = jnp.concatenate(
        [params["bq"] * scale, params["bk"], params["bv"]], axis=1
    ).astype(jnp.float32)                                           # (1, 3E)
    wo = params["wo"].T.astype(jnp.bfloat16)                        # (E, E)

    kernel = functools.partial(_rgbm_fuse_kernel, heads=heads, eps=eps)

    itemsize = rgb.dtype.itemsize
    flops = int(2 * B * Lq * E * E              # Q projection
                + 2 * B * Lk * E * 2 * E        # K|V projection
                + 4 * B * heads * Lq * Lk * hd  # QK^T + PV
                + 2 * B * Lq * E * E)           # output projection
    bytes_accessed = int(rgb.size * itemsize + mask.size * itemsize
                         + wqkv.size * 2 + wo.size * 2
                         + (bqkv.size + params["bo"].size
                            + params["gamma"].size + params["beta"].size) * 4
                         + B * Lq * E * itemsize)
    cost = pl.CostEstimate(flops=flops,
                           transcendentals=int(B * heads * Lq * Lk),
                           bytes_accessed=bytes_accessed)

    full = lambda shape: pl.BlockSpec(shape, lambda i: (0,) * len(shape))

    return pl.pallas_call(
        kernel,
        out_shape=jax.ShapeDtypeStruct((B, Lq, E), rgb.dtype),
        grid_spec=pltpu.PrefetchScalarGridSpec(
            num_scalar_prefetch=0,
            grid=(num_chunks,),
            in_specs=[
                pl.BlockSpec((Bc, Lq, E), lambda i: (i, 0, 0)),   # rgb chunk
                pl.BlockSpec((Bc, Lk, E), lambda i: (i, 0, 0)),   # mask chunk
                full((E, 3 * E)),        # Wq|Wk|Wv (pre-transposed, Q pre-scaled), bf16
                full((E, E)),            # Wo (pre-transposed), bf16
                full((1, 3 * E)),        # bq|bk|bv fused (bq pre-scaled)
                full((1, E)),            # bo
                full((1, E)),            # LayerNorm gamma
                full((1, E)),            # LayerNorm beta
            ],
            out_specs=pl.BlockSpec((Bc, Lq, E), lambda i: (i, 0, 0)),
        ),
        compiler_params=pltpu.CompilerParams(
            dimension_semantics=("parallel",) if num_chunks > 1 else ("arbitrary",)),
        cost_estimate=cost,
    )(rgb, mask, wqkv, wo, bqkv, params["bo"], params["gamma"], params["beta"])


def rgbm_fuse_reference(rgb, mask, params, *, heads: int, eps: float = 1e-5):
    """Pure-JAX f32 reference mirroring torch.nn.MultiheadAttention + LayerNorm."""
    B, Lq, E = rgb.shape
    Lk = mask.shape[1]
    hd = E // heads
    q = jnp.einsum("ble,fe->blf", rgb, params["wq"]) + params["bq"][0]
    k = jnp.einsum("ble,fe->blf", mask, params["wk"]) + params["bk"][0]
    v = jnp.einsum("ble,fe->blf", mask, params["wv"]) + params["bv"][0]
    q = q.reshape(B, Lq, heads, hd)
    k = k.reshape(B, Lk, heads, hd)
    v = v.reshape(B, Lk, heads, hd)
    s = jnp.einsum("bqhd,bkhd->bhqk", q, k) / math.sqrt(hd)
    p = jax.nn.softmax(s, axis=-1)
    o = jnp.einsum("bhqk,bkhd->bqhd", p, v).reshape(B, Lq, E)
    proj = jnp.einsum("ble,fe->blf", o, params["wo"]) + params["bo"][0]
    y = rgb + proj
    mu = jnp.mean(y, axis=-1, keepdims=True)
    var = jnp.mean((y - mu) ** 2, axis=-1, keepdims=True)
    return (y - mu) / jnp.sqrt(var + eps) * params["gamma"][0] + params["beta"][0]


def init_params(key, rgb_dim):
    ks = jax.random.split(key, 8)
    scale = 0.02
    return {
        "wq": scale * jax.random.normal(ks[0], (rgb_dim, rgb_dim), jnp.float32),
        "wk": scale * jax.random.normal(ks[1], (rgb_dim, rgb_dim), jnp.float32),
        "wv": scale * jax.random.normal(ks[2], (rgb_dim, rgb_dim), jnp.float32),
        "wo": scale * jax.random.normal(ks[3], (rgb_dim, rgb_dim), jnp.float32),
        "bq": scale * jax.random.normal(ks[4], (1, rgb_dim), jnp.float32),
        "bk": scale * jax.random.normal(ks[5], (1, rgb_dim), jnp.float32),
        "bv": scale * jax.random.normal(ks[6], (1, rgb_dim), jnp.float32),
        "bo": scale * jax.random.normal(ks[7], (1, rgb_dim), jnp.float32),
        "gamma": jnp.ones((1, rgb_dim), jnp.float32),   # LayerNorm weight
        "beta": jnp.zeros((1, rgb_dim), jnp.float32),   # LayerNorm bias
    }


if __name__ == "__main__":
    # E = 128 keeps every I/O block trailing-dim lane-dense ((8,128)-aligned).
    B, Lq, Lk, E, HEADS = 2, 8, 8, 128, 8   # rgb_dim = mask_dim = 128, head_dim = 16

    key = jax.random.PRNGKey(0)
    k_rgb, k_mask, k_par = jax.random.split(key, 3)
    rgb = jax.random.normal(k_rgb, (B, Lq, E), jnp.float32)
    mask = jax.random.normal(k_mask, (B, Lk, E), jnp.float32)
    params = init_params(k_par, E)

    out = jax.block_until_ready(rgbm_fuse(rgb, mask, params, heads=HEADS))
    ref = jax.block_until_ready(rgbm_fuse_reference(rgb, mask, params, heads=HEADS))

    assert out.shape == (B, Lq, E)
    # bf16 MXU operands (f32 accumulation) vs. pure-f32 reference: ~1e-3-level error.
    assert jnp.allclose(out, ref, atol=1e-2, rtol=1e-2), "mismatch vs reference"

    print("KERNEL_OK")
</pallas_src>

<mosaic_0001>
module attributes {stable_mosaic.version = 11 : i64} {
  func.func @_rgbm_fuse_kernel(%arg0: i32, %arg1: memref<2x8x128xf32, #tpu.memory_space<vmem>>, %arg2: memref<2x8x128xf32, #tpu.memory_space<vmem>>, %arg3: memref<128x384xbf16, #tpu.memory_space<vmem>>, %arg4: memref<128x128xbf16, #tpu.memory_space<vmem>>, %arg5: memref<1x384xf32, #tpu.memory_space<vmem>>, %arg6: memref<1x128xf32, #tpu.memory_space<vmem>>, %arg7: memref<1x128xf32, #tpu.memory_space<vmem>>, %arg8: memref<1x128xf32, #tpu.memory_space<vmem>>, %arg9: memref<2x8x128xf32, #tpu.memory_space<vmem>>) attributes {dimension_semantics = [#tpu.dimension_semantics<arbitrary>], iteration_bounds = array<i64: 1>, scalar_prefetch = 0 : i64, scratch_operands = 0 : i64, tpu.core_type = #tpu.core_type<tc>, window_params = [{transform_indices = @transform_0, window_bounds = array<i64: 2, 8, 128>}, {transform_indices = @transform_1, window_bounds = array<i64: 2, 8, 128>}, {pipeline_mode = #tpu.pipeline_mode<synchronous>, transform_indices = @transform_2, window_bounds = array<i64: 128, 384>}, {pipeline_mode = #tpu.pipeline_mode<synchronous>, transform_indices = @transform_3, window_bounds = array<i64: 128, 128>}, {pipeline_mode = #tpu.pipeline_mode<synchronous>, transform_indices = @transform_4, window_bounds = array<i64: 1, 384>}, {pipeline_mode = #tpu.pipeline_mode<synchronous>, transform_indices = @transform_5, window_bounds = array<i64: 1, 128>}, {pipeline_mode = #tpu.pipeline_mode<synchronous>, transform_indices = @transform_6, window_bounds = array<i64: 1, 128>}, {pipeline_mode = #tpu.pipeline_mode<synchronous>, transform_indices = @transform_7, window_bounds = array<i64: 1, 128>}, {transform_indices = @transform_8, window_bounds = array<i64: 2, 8, 128>}]} {
    %c0 = arith.constant 0 : index
    %c0_0 = arith.constant 0 : index
    %c0_1 = arith.constant 0 : index
    %0 = vector.load %arg1[%c0, %c0_0, %c0_1] : memref<2x8x128xf32, #tpu.memory_space<vmem>>, vector<2x8x128xf32>
    %1 = vector.shape_cast %0 : vector<2x8x128xf32> to vector<16x128xf32>
    %c0_2 = arith.constant 0 : index
    %c0_3 = arith.constant 0 : index
    %c0_4 = arith.constant 0 : index
    %2 = vector.load %arg2[%c0_2, %c0_3, %c0_4] : memref<2x8x128xf32, #tpu.memory_space<vmem>>, vector<2x8x128xf32>
    %3 = vector.shape_cast %2 : vector<2x8x128xf32> to vector<16x128xf32>
    %4 = tpu.concatenate %1, %3 in 0 : vector<16x128xf32>, vector<16x128xf32> -> vector<32x128xf32>
    %5 = arith.truncf %4 : vector<32x128xf32> to vector<32x128xbf16>
    %c0_5 = arith.constant 0 : index
    %c0_6 = arith.constant 0 : index
    %6 = vector.load %arg3[%c0_5, %c0_6] : memref<128x384xbf16, #tpu.memory_space<vmem>>, vector<128x384xbf16>
    %cst = arith.constant dense<0.000000e+00> : vector<32x384xf32>
    %7 = tpu.matmul %5, %6, %cst {dimension_numbers = #tpu.dot_dimension_numbers<[1], [0], [0], [1], [0, 0, 1, 1], [], []>} : vector<32x128xbf16>, vector<128x384xbf16>, vector<32x384xf32> -> vector<32x384xf32>
    %c0_7 = arith.constant 0 : index
    %c0_8 = arith.constant 0 : index
    %8 = vector.load %arg5[%c0_7, %c0_8] : memref<1x384xf32, #tpu.memory_space<vmem>>, vector<1x384xf32>
    %9 = vector.broadcast %8 : vector<1x384xf32> to vector<32x384xf32>
    %10 = arith.addf %7, %9 : vector<32x384xf32>
    %11 = vector.extract_strided_slice %10 {offsets = [0, 0], sizes = [16, 128], strides = [1, 1]} : vector<32x384xf32> to vector<16x128xf32>
    %12 = vector.extract_strided_slice %10 {offsets = [16, 128], sizes = [16, 256], strides = [1, 1]} : vector<32x384xf32> to vector<16x256xf32>
    %13 = vector.shape_cast %11 : vector<16x128xf32> to vector<2x8x128xf32>
    %14 = vector.shape_cast %12 : vector<16x256xf32> to vector<2x8x256xf32>
    %15 = vector.extract_strided_slice %13 {offsets = [0, 0, 0], sizes = [2, 8, 16], strides = [1, 1, 1]} : vector<2x8x128xf32> to vector<2x8x16xf32>
    %16 = arith.truncf %15 : vector<2x8x16xf32> to vector<2x8x16xbf16>
    %17 = vector.extract_strided_slice %14 {offsets = [0, 0, 0], sizes = [2, 8, 16], strides = [1, 1, 1]} : vector<2x8x256xf32> to vector<2x8x16xf32>
    %18 = arith.truncf %17 : vector<2x8x16xf32> to vector<2x8x16xbf16>
    %19 = vector.extract_strided_slice %14 {offsets = [0, 0, 128], sizes = [2, 8, 16], strides = [1, 1, 1]} : vector<2x8x256xf32> to vector<2x8x16xf32>
    %20 = arith.truncf %19 : vector<2x8x16xf32> to vector<2x8x16xbf16>
    "tpu.trace_start"() <{level = 10 : i32, message = "bqd,bkd->bqk"}> : () -> ()
    %cst_9 = arith.constant dense<0.000000e+00> : vector<2x8x8xf32>
    %21 = tpu.matmul %16, %18, %cst_9 {dimension_numbers = #tpu.dot_dimension_numbers<[2], [2], [1], [1], [0, 0, 0, 1, 1, 1], [0], [0]>} : vector<2x8x16xbf16>, vector<2x8x16xbf16>, vector<2x8x8xf32> -> vector<2x8x8xf32>
    "tpu.trace_stop"() : () -> ()
    %cst_10 = arith.constant dense<0xFF800000> : vector<2x8xf32>
    %22 = vector.multi_reduction <maximumf>, %21, %cst_10 [2] : vector<2x8x8xf32> to vector<2x8xf32>
    %23 = vector.shape_cast %22 : vector<2x8xf32> to vector<2x8x1xf32>
    %24 = vector.broadcast %23 : vector<2x8x1xf32> to vector<2x8x8xf32>
    %25 = arith.subf %21, %24 : vector<2x8x8xf32>
    %26 = math.exp %25 : vector<2x8x8xf32>
    %cst_11 = arith.constant dense<0.000000e+00> : vector<2x8xf32>
    %27 = vector.multi_reduction <add>, %26, %cst_11 [2] : vector<2x8x8xf32> to vector<2x8xf32>
    %28 = vector.shape_cast %27 : vector<2x8xf32> to vector<2x8x1xf32>
    %29 = vector.broadcast %28 : vector<2x8x1xf32> to vector<2x8x8xf32>
    %30 = arith.divf %26, %29 : vector<2x8x8xf32>
    %31 = arith.truncf %30 : vector<2x8x8xf32> to vector<2x8x8xbf16>
    "tpu.trace_start"() <{level = 10 : i32, message = "bqk,bkd->bqd"}> : () -> ()
    %cst_12 = arith.constant dense<0.000000e+00> : vector<2x8x16xf32>
    %32 = tpu.matmul %31, %20, %cst_12 {dimension_numbers = #tpu.dot_dimension_numbers<[2], [1], [1], [2], [0, 0, 0, 1, 1, 2], [0], [0]>} : vector<2x8x8xbf16>, vector<2x8x16xbf16>, vector<2x8x16xf32> -> vector<2x8x16xf32>
    "tpu.trace_stop"() : () -> ()
    %33 = vector.extract_strided_slice %13 {offsets = [0, 0, 16], sizes = [2, 8, 16], strides = [1, 1, 1]} : vector<2x8x128xf32> to vector<2x8x16xf32>
    %34 = arith.truncf %33 : vector<2x8x16xf32> to vector<2x8x16xbf16>
    %35 = vector.extract_strided_slice %14 {offsets = [0, 0, 16], sizes = [2, 8, 16], strides = [1, 1, 1]} : vector<2x8x256xf32> to vector<2x8x16xf32>
    %36 = arith.truncf %35 : vector<2x8x16xf32> to vector<2x8x16xbf16>
    %37 = vector.extract_strided_slice %14 {offsets = [0, 0, 144], sizes = [2, 8, 16], strides = [1, 1, 1]} : vector<2x8x256xf32> to vector<2x8x16xf32>
    %38 = arith.truncf %37 : vector<2x8x16xf32> to vector<2x8x16xbf16>
    "tpu.trace_start"() <{level = 10 : i32, message = "bqd,bkd->bqk"}> : () -> ()
    %cst_13 = arith.constant dense<0.000000e+00> : vector<2x8x8xf32>
    %39 = tpu.matmul %34, %36, %cst_13 {dimension_numbers = #tpu.dot_dimension_numbers<[2], [2], [1], [1], [0, 0, 0, 1, 1, 1], [0], [0]>} : vector<2x8x16xbf16>, vector<2x8x16xbf16>, vector<2x8x8xf32> -> vector<2x8x8xf32>
    "tpu.trace_stop"() : () -> ()
    %cst_14 = arith.constant dense<0xFF800000> : vector<2x8xf32>
    %40 = vector.multi_reduction <maximumf>, %39, %cst_14 [2] : vector<2x8x8xf32> to vector<2x8xf32>
    %41 = vector.shape_cast %40 : vector<2x8xf32> to vector<2x8x1xf32>
    %42 = vector.broadcast %41 : vector<2x8x1xf32> to vector<2x8x8xf32>
    %43 = arith.subf %39, %42 : vector<2x8x8xf32>
    %44 = math.exp %43 : vector<2x8x8xf32>
    %cst_15 = arith.constant dense<0.000000e+00> : vector<2x8xf32>
    %45 = vector.multi_reduction <add>, %44, %cst_15 [2] : vector<2x8x8xf32> to vector<2x8xf32>
    %46 = vector.shape_cast %45 : vector<2x8xf32> to vector<2x8x1xf32>
    %47 = vector.broadcast %46 : vector<2x8x1xf32> to vector<2x8x8xf32>
    %48 = arith.divf %44, %47 : vector<2x8x8xf32>
    %49 = arith.truncf %48 : vector<2x8x8xf32> to vector<2x8x8xbf16>
    "tpu.trace_start"() <{level = 10 : i32, message = "bqk,bkd->bqd"}> : () -> ()
    %cst_16 = arith.constant dense<0.000000e+00> : vector<2x8x16xf32>
    %50 = tpu.matmul %49, %38, %cst_16 {dimension_numbers = #tpu.dot_dimension_numbers<[2], [1], [1], [2], [0, 0, 0, 1, 1, 2], [0], [0]>} : vector<2x8x8xbf16>, vector<2x8x16xbf16>, vector<2x8x16xf32> -> vector<2x8x16xf32>
    "tpu.trace_stop"() : () -> ()
    %51 = vector.extract_strided_slice %13 {offsets = [0, 0, 32], sizes = [2, 8, 16], strides = [1, 1, 1]} : vector<2x8x128xf32> to vector<2x8x16xf32>
    %52 = arith.truncf %51 : vector<2x8x16xf32> to vector<2x8x16xbf16>
    %53 = vector.extract_strided_slice %14 {offsets = [0, 0, 32], sizes = [2, 8, 16], strides = [1, 1, 1]} : vector<2x8x256xf32> to vector<2x8x16xf32>
    %54 = arith.truncf %53 : vector<2x8x16xf32> to vector<2x8x16xbf16>
    %55 = vector.extract_strided_slice %14 {offsets = [0, 0, 160], sizes = [2, 8, 16], strides = [1, 1, 1]} : vector<2x8x256xf32> to vector<2x8x16xf32>
    %56 = arith.truncf %55 : vector<2x8x16xf32> to vector<2x8x16xbf16>
    "tpu.trace_start"() <{level = 10 : i32, message = "bqd,bkd->bqk"}> : () -> ()
    %cst_17 = arith.constant dense<0.000000e+00> : vector<2x8x8xf32>
    %57 = tpu.matmul %52, %54, %cst_17 {dimension_numbers = #tpu.dot_dimension_numbers<[2], [2], [1], [1], [0, 0, 0, 1, 1, 1], [0], [0]>} : vector<2x8x16xbf16>, vector<2x8x16xbf16>, vector<2x8x8xf32> -> vector<2x8x8xf32>
    "tpu.trace_stop"() : () -> ()
    %cst_18 = arith.constant dense<0xFF800000> : vector<2x8xf32>
    %58 = vector.multi_reduction <maximumf>, %57, %cst_18 [2] : vector<2x8x8xf32> to vector<2x8xf32>
    %59 = vector.shape_cast %58 : vector<2x8xf32> to vector<2x8x1xf32>
    %60 = vector.broadcast %59 : vector<2x8x1xf32> to vector<2x8x8xf32>
    %61 = arith.subf %57, %60 : vector<2x8x8xf32>
    %62 = math.exp %61 : vector<2x8x8xf32>
    %cst_19 = arith.constant dense<0.000000e+00> : vector<2x8xf32>
    %63 = vector.multi_reduction <add>, %62, %cst_19 [2] : vector<2x8x8xf32> to vector<2x8xf32>
    %64 = vector.shape_cast %63 : vector<2x8xf32> to vector<2x8x1xf32>
    %65 = vector.broadcast %64 : vector<2x8x1xf32> to vector<2x8x8xf32>
    %66 = arith.divf %62, %65 : vector<2x8x8xf32>
    %67 = arith.truncf %66 : vector<2x8x8xf32> to vector<2x8x8xbf16>
    "tpu.trace_start"() <{level = 10 : i32, message = "bqk,bkd->bqd"}> : () -> ()
    %cst_20 = arith.constant dense<0.000000e+00> : vector<2x8x16xf32>
    %68 = tpu.matmul %67, %56, %cst_20 {dimension_numbers = #tpu.dot_dimension_numbers<[2], [1], [1], [2], [0, 0, 0, 1, 1, 2], [0], [0]>} : vector<2x8x8xbf16>, vector<2x8x16xbf16>, vector<2x8x16xf32> -> vector<2x8x16xf32>
    "tpu.trace_stop"() : () -> ()
    %69 = vector.extract_strided_slice %13 {offsets = [0, 0, 48], sizes = [2, 8, 16], strides = [1, 1, 1]} : vector<2x8x128xf32> to vector<2x8x16xf32>
    %70 = arith.truncf %69 : vector<2x8x16xf32> to vector<2x8x16xbf16>
    %71 = vector.extract_strided_slice %14 {offsets = [0, 0, 48], sizes = [2, 8, 16], strides = [1, 1, 1]} : vector<2x8x256xf32> to vector<2x8x16xf32>
    %72 = arith.truncf %71 : vector<2x8x16xf32> to vector<2x8x16xbf16>
    %73 = vector.extract_strided_slice %14 {offsets = [0, 0, 176], sizes = [2, 8, 16], strides = [1, 1, 1]} : vector<2x8x256xf32> to vector<2x8x16xf32>
    %74 = arith.truncf %73 : vector<2x8x16xf32> to vector<2x8x16xbf16>
    "tpu.trace_start"() <{level = 10 : i32, message = "bqd,bkd->bqk"}> : () -> ()
    %cst_21 = arith.constant dense<0.000000e+00> : vector<2x8x8xf32>
    %75 = tpu.matmul %70, %72, %cst_21 {dimension_numbers = #tpu.dot_dimension_numbers<[2], [2], [1], [1], [0, 0, 0, 1, 1, 1], [0], [0]>} : vector<2x8x16xbf16>, vector<2x8x16xbf16>, vector<2x8x8xf32> -> vector<2x8x8xf32>
    "tpu.trace_stop"() : () -> ()
    %cst_22 = arith.constant dense<0xFF800000> : vector<2x8xf32>
    %76 = vector.multi_reduction <maximumf>, %75, %cst_22 [2] : vector<2x8x8xf32> to vector<2x8xf32>
    %77 = vector.shape_cast %76 : vector<2x8xf32> to vector<2x8x1xf32>
    %78 = vector.broadcast %77 : vector<2x8x1xf32> to vector<2x8x8xf32>
    %79 = arith.subf %75, %78 : vector<2x8x8xf32>
    %80 = math.exp %79 : vector<2x8x8xf32>
    %cst_23 = arith.constant dense<0.000000e+00> : vector<2x8xf32>
    %81 = vector.multi_reduction <add>, %80, %cst_23 [2] : vector<2x8x8xf32> to vector<2x8xf32>
    %82 = vector.shape_cast %81 : vector<2x8xf32> to vector<2x8x1xf32>
    %83 = vector.broadcast %82 : vector<2x8x1xf32> to vector<2x8x8xf32>
    %84 = arith.divf %80, %83 : vector<2x8x8xf32>
    %85 = arith.truncf %84 : vector<2x8x8xf32> to vector<2x8x8xbf16>
    "tpu.trace_start"() <{level = 10 : i32, message = "bqk,bkd->bqd"}> : () -> ()
    %cst_24 = arith.constant dense<0.000000e+00> : vector<2x8x16xf32>
    %86 = tpu.matmul %85, %74, %cst_24 {dimension_numbers = #tpu.dot_dimension_numbers<[2], [1], [1], [2], [0, 0, 0, 1, 1, 2], [0], [0]>} : vector<2x8x8xbf16>, vector<2x8x16xbf16>, vector<2x8x16xf32> -> vector<2x8x16xf32>
    "tpu.trace_stop"() : () -> ()
    %87 = vector.extract_strided_slice %13 {offsets = [0, 0, 64], sizes = [2, 8, 16], strides = [1, 1, 1]} : vector<2x8x128xf32> to vector<2x8x16xf32>
    %88 = arith.truncf %87 : vector<2x8x16xf32> to vector<2x8x16xbf16>
    %89 = vector.extract_strided_slice %14 {offsets = [0, 0, 64], sizes = [2, 8, 16], strides = [1, 1, 1]} : vector<2x8x256xf32> to vector<2x8x16xf32>
    %90 = arith.truncf %89 : vector<2x8x16xf32> to vector<2x8x16xbf16>
    %91 = vector.extract_strided_slice %14 {offsets = [0, 0, 192], sizes = [2, 8, 16], strides = [1, 1, 1]} : vector<2x8x256xf32> to vector<2x8x16xf32>
    %92 = arith.truncf %91 : vector<2x8x16xf32> to vector<2x8x16xbf16>
    "tpu.trace_start"() <{level = 10 : i32, message = "bqd,bkd->bqk"}> : () -> ()
    %cst_25 = arith.constant dense<0.000000e+00> : vector<2x8x8xf32>
    %93 = tpu.matmul %88, %90, %cst_25 {dimension_numbers = #tpu.dot_dimension_numbers<[2], [2], [1], [1], [0, 0, 0, 1, 1, 1], [0], [0]>} : vector<2x8x16xbf16>, vector<2x8x16xbf16>, vector<2x8x8xf32> -> vector<2x8x8xf32>
    "tpu.trace_stop"() : () -> ()
    %cst_26 = arith.constant dense<0xFF800000> : vector<2x8xf32>
    %94 = vector.multi_reduction <maximumf>, %93, %cst_26 [2] : vector<2x8x8xf32> to vector<2x8xf32>
    %95 = vector.shape_cast %94 : vector<2x8xf32> to vector<2x8x1xf32>
    %96 = vector.broadcast %95 : vector<2x8x1xf32> to vector<2x8x8xf32>
    %97 = arith.subf %93, %96 : vector<2x8x8xf32>
    %98 = math.exp %97 : vector<2x8x8xf32>
    %cst_27 = arith.constant dense<0.000000e+00> : vector<2x8xf32>
    %99 = vector.multi_reduction <add>, %98, %cst_27 [2] : vector<2x8x8xf32> to vector<2x8xf32>
    %100 = vector.shape_cast %99 : vector<2x8xf32> to vector<2x8x1xf32>
    %101 = vector.broadcast %100 : vector<2x8x1xf32> to vector<2x8x8xf32>
    %102 = arith.divf %98, %101 : vector<2x8x8xf32>
    %103 = arith.truncf %102 : vector<2x8x8xf32> to vector<2x8x8xbf16>
    "tpu.trace_start"() <{level = 10 : i32, message = "bqk,bkd->bqd"}> : () -> ()
    %cst_28 = arith.constant dense<0.000000e+00> : vector<2x8x16xf32>
    %104 = tpu.matmul %103, %92, %cst_28 {dimension_numbers = #tpu.dot_dimension_numbers<[2], [1], [1], [2], [0, 0, 0, 1, 1, 2], [0], [0]>} : vector<2x8x8xbf16>, vector<2x8x16xbf16>, vector<2x8x16xf32> -> vector<2x8x16xf32>
    "tpu.trace_stop"() : () -> ()
    %105 = vector.extract_strided_slice %13 {offsets = [0, 0, 80], sizes = [2, 8, 16], strides = [1, 1, 1]} : vector<2x8x128xf32> to vector<2x8x16xf32>
    %106 = arith.truncf %105 : vector<2x8x16xf32> to vector<2x8x16xbf16>
    %107 = vector.extract_strided_slice %14 {offsets = [0, 0, 80], sizes = [2, 8, 16], strides = [1, 1, 1]} : vector<2x8x256xf32> to vector<2x8x16xf32>
    %108 = arith.truncf %107 : vector<2x8x16xf32> to vector<2x8x16xbf16>
    %109 = vector.extract_strided_slice %14 {offsets = [0, 0, 208], sizes = [2, 8, 16], strides = [1, 1, 1]} : vector<2x8x256xf32> to vector<2x8x16xf32>
    %110 = arith.truncf %109 : vector<2x8x16xf32> to vector<2x8x16xbf16>
    "tpu.trace_start"() <{level = 10 : i32, message = "bqd,bkd->bqk"}> : () -> ()
    %cst_29 = arith.constant dense<0.000000e+00> : vector<2x8x8xf32>
    %111 = tpu.matmul %106, %108, %cst_29 {dimension_numbers = #tpu.dot_dimension_numbers<[2], [2], [1], [1], [0, 0, 0, 1, 1, 1], [0], [0]>} : vector<2x8x16xbf16>, vector<2x8x16xbf16>, vector<2x8x8xf32> -> vector<2x8x8xf32>
    "tpu.trace_stop"() : () -> ()
    %cst_30 = arith.constant dense<0xFF800000> : vector<2x8xf32>
    %112 = vector.multi_reduction <maximumf>, %111, %cst_30 [2] : vector<2x8x8xf32> to vector<2x8xf32>
    %113 = vector.shape_cast %112 : vector<2x8xf32> to vector<2x8x1xf32>
    %114 = vector.broadcast %113 : vector<2x8x1xf32> to vector<2x8x8xf32>
    %115 = arith.subf %111, %114 : vector<2x8x8xf32>
    %116 = math.exp %115 : vector<2x8x8xf32>
    %cst_31 = arith.constant dense<0.000000e+00> : vector<2x8xf32>
    %117 = vector.multi_reduction <add>, %116, %cst_31 [2] : vector<2x8x8xf32> to vector<2x8xf32>
    %118 = vector.shape_cast %117 : vector<2x8xf32> to vector<2x8x1xf32>
    %119 = vector.broadcast %118 : vector<2x8x1xf32> to vector<2x8x8xf32>
    %120 = arith.divf %116, %119 : vector<2x8x8xf32>
    %121 = arith.truncf %120 : vector<2x8x8xf32> to vector<2x8x8xbf16>
    "tpu.trace_start"() <{level = 10 : i32, message = "bqk,bkd->bqd"}> : () -> ()
    %cst_32 = arith.constant dense<0.000000e+00> : vector<2x8x16xf32>
    %122 = tpu.matmul %121, %110, %cst_32 {dimension_numbers = #tpu.dot_dimension_numbers<[2], [1], [1], [2], [0, 0, 0, 1, 1, 2], [0], [0]>} : vector<2x8x8xbf16>, vector<2x8x16xbf16>, vector<2x8x16xf32> -> vector<2x8x16xf32>
    "tpu.trace_stop"() : () -> ()
    %123 = vector.extract_strided_slice %13 {offsets = [0, 0, 96], sizes = [2, 8, 16], strides = [1, 1, 1]} : vector<2x8x128xf32> to vector<2x8x16xf32>
    %124 = arith.truncf %123 : vector<2x8x16xf32> to vector<2x8x16xbf16>
    %125 = vector.extract_strided_slice %14 {offsets = [0, 0, 96], sizes = [2, 8, 16], strides = [1, 1, 1]} : vector<2x8x256xf32> to vector<2x8x16xf32>
    %126 = arith.truncf %125 : vector<2x8x16xf32> to vector<2x8x16xbf16>
    %127 = vector.extract_strided_slice %14 {offsets = [0, 0, 224], sizes = [2, 8, 16], strides = [1, 1, 1]} : vector<2x8x256xf32> to vector<2x8x16xf32>
    %128 = arith.truncf %127 : vector<2x8x16xf32> to vector<2x8x16xbf16>
    "tpu.trace_start"() <{level = 10 : i32, message = "bqd,bkd->bqk"}> : () -> ()
    %cst_33 = arith.constant dense<0.000000e+00> : vector<2x8x8xf32>
    %129 = tpu.matmul %124, %126, %cst_33 {dimension_numbers = #tpu.dot_dimension_numbers<[2], [2], [1], [1], [0, 0, 0, 1, 1, 1], [0], [0]>} : vector<2x8x16xbf16>, vector<2x8x16xbf16>, vector<2x8x8xf32> -> vector<2x8x8xf32>
    "tpu.trace_stop"() : () -> ()
    %cst_34 = arith.constant dense<0xFF800000> : vector<2x8xf32>
    %130 = vector.multi_reduction <maximumf>, %129, %cst_34 [2] : vector<2x8x8xf32> to vector<2x8xf32>
    %131 = vector.shape_cast %130 : vector<2x8xf32> to vector<2x8x1xf32>
    %132 = vector.broadcast %131 : vector<2x8x1xf32> to vector<2x8x8xf32>
    %133 = arith.subf %129, %132 : vector<2x8x8xf32>
    %134 = math.exp %133 : vector<2x8x8xf32>
    %cst_35 = arith.constant dense<0.000000e+00> : vector<2x8xf32>
    %135 = vector.multi_reduction <add>, %134, %cst_35 [2] : vector<2x8x8xf32> to vector<2x8xf32>
    %136 = vector.shape_cast %135 : vector<2x8xf32> to vector<2x8x1xf32>
    %137 = vector.broadcast %136 : vector<2x8x1xf32> to vector<2x8x8xf32>
    %138 = arith.divf %134, %137 : vector<2x8x8xf32>
    %139 = arith.truncf %138 : vector<2x8x8xf32> to vector<2x8x8xbf16>
    "tpu.trace_start"() <{level = 10 : i32, message = "bqk,bkd->bqd"}> : () -> ()
    %cst_36 = arith.constant dense<0.000000e+00> : vector<2x8x16xf32>
    %140 = tpu.matmul %139, %128, %cst_36 {dimension_numbers = #tpu.dot_dimension_numbers<[2], [1], [1], [2], [0, 0, 0, 1, 1, 2], [0], [0]>} : vector<2x8x8xbf16>, vector<2x8x16xbf16>, vector<2x8x16xf32> -> vector<2x8x16xf32>
    "tpu.trace_stop"() : () -> ()
    %141 = vector.extract_strided_slice %13 {offsets = [0, 0, 112], sizes = [2, 8, 16], strides = [1, 1, 1]} : vector<2x8x128xf32> to vector<2x8x16xf32>
    %142 = arith.truncf %141 : vector<2x8x16xf32> to vector<2x8x16xbf16>
    %143 = vector.extract_strided_slice %14 {offsets = [0, 0, 112], sizes = [2, 8, 16], strides = [1, 1, 1]} : vector<2x8x256xf32> to vector<2x8x16xf32>
    %144 = arith.truncf %143 : vector<2x8x16xf32> to vector<2x8x16xbf16>
    %145 = vector.extract_strided_slice %14 {offsets = [0, 0, 240], sizes = [2, 8, 16], strides = [1, 1, 1]} : vector<2x8x256xf32> to vector<2x8x16xf32>
    %146 = arith.truncf %145 : vector<2x8x16xf32> to vector<2x8x16xbf16>
    "tpu.trace_start"() <{level = 10 : i32, message = "bqd,bkd->bqk"}> : () -> ()
    %cst_37 = arith.constant dense<0.000000e+00> : vector<2x8x8xf32>
    %147 = tpu.matmul %142, %144, %cst_37 {dimension_numbers = #tpu.dot_dimension_numbers<[2], [2], [1], [1], [0, 0, 0, 1, 1, 1], [0], [0]>} : vector<2x8x16xbf16>, vector<2x8x16xbf16>, vector<2x8x8xf32> -> vector<2x8x8xf32>
    "tpu.trace_stop"() : () -> ()
    %cst_38 = arith.constant dense<0xFF800000> : vector<2x8xf32>
    %148 = vector.multi_reduction <maximumf>, %147, %cst_38 [2] : vector<2x8x8xf32> to vector<2x8xf32>
    %149 = vector.shape_cast %148 : vector<2x8xf32> to vector<2x8x1xf32>
    %150 = vector.broadcast %149 : vector<2x8x1xf32> to vector<2x8x8xf32>
    %151 = arith.subf %147, %150 : vector<2x8x8xf32>
    %152 = math.exp %151 : vector<2x8x8xf32>
    %cst_39 = arith.constant dense<0.000000e+00> : vector<2x8xf32>
    %153 = vector.multi_reduction <add>, %152, %cst_39 [2] : vector<2x8x8xf32> to vector<2x8xf32>
    %154 = vector.shape_cast %153 : vector<2x8xf32> to vector<2x8x1xf32>
    %155 = vector.broadcast %154 : vector<2x8x1xf32> to vector<2x8x8xf32>
    %156 = arith.divf %152, %155 : vector<2x8x8xf32>
    %157 = arith.truncf %156 : vector<2x8x8xf32> to vector<2x8x8xbf16>
    "tpu.trace_start"() <{level = 10 : i32, message = "bqk,bkd->bqd"}> : () -> ()
    %cst_40 = arith.constant dense<0.000000e+00> : vector<2x8x16xf32>
    %158 = tpu.matmul %157, %146, %cst_40 {dimension_numbers = #tpu.dot_dimension_numbers<[2], [1], [1], [2], [0, 0, 0, 1, 1, 2], [0], [0]>} : vector<2x8x8xbf16>, vector<2x8x16xbf16>, vector<2x8x16xf32> -> vector<2x8x16xf32>
    "tpu.trace_stop"() : () -> ()
    %159 = tpu.concatenate %32, %50, %68, %86, %104, %122, %140, %158 in 2 : vector<2x8x16xf32>, vector<2x8x16xf32>, vector<2x8x16xf32>, vector<2x8x16xf32>, vector<2x8x16xf32>, vector<2x8x16xf32>, vector<2x8x16xf32>, vector<2x8x16xf32> -> vector<2x8x128xf32>
    %160 = vector.shape_cast %159 : vector<2x8x128xf32> to vector<16x128xf32>
    %161 = arith.truncf %160 : vector<16x128xf32> to vector<16x128xbf16>
    %c0_41 = arith.constant 0 : index
    %c0_42 = arith.constant 0 : index
    %162 = vector.load %arg4[%c0_41, %c0_42] : memref<128x128xbf16, #tpu.memory_space<vmem>>, vector<128x128xbf16>
    %cst_43 = arith.constant dense<0.000000e+00> : vector<16x128xf32>
    %163 = tpu.matmul %161, %162, %cst_43 {dimension_numbers = #tpu.dot_dimension_numbers<[1], [0], [0], [1], [0, 0, 1, 1], [], []>} : vector<16x128xbf16>, vector<128x128xbf16>, vector<16x128xf32> -> vector<16x128xf32>
    %c0_44 = arith.constant 0 : index
    %c0_45 = arith.constant 0 : index
    %164 = vector.load %arg6[%c0_44, %c0_45] : memref<1x128xf32, #tpu.memory_space<vmem>>, vector<1x128xf32>
    %165 = vector.broadcast %164 : vector<1x128xf32> to vector<16x128xf32>
    %166 = arith.addf %163, %165 : vector<16x128xf32>
    %167 = arith.addf %1, %166 : vector<16x128xf32>
    %cst_46 = arith.constant dense<0.000000e+00> : vector<16xf32>
    %168 = vector.multi_reduction <add>, %167, %cst_46 [1] : vector<16x128xf32> to vector<16xf32>
    %169 = vector.shape_cast %168 : vector<16xf32> to vector<16x1xf32>
    %cst_47 = arith.constant 1.280000e+02 : f32
    %170 = vector.broadcast %cst_47 : f32 to vector<16x1xf32>
    %171 = arith.divf %169, %170 : vector<16x1xf32>
    %172 = vector.broadcast %171 : vector<16x1xf32> to vector<16x128xf32>
    %173 = arith.subf %167, %172 : vector<16x128xf32>
    %174 = vector.broadcast %171 : vector<16x1xf32> to vector<16x128xf32>
    %175 = arith.subf %167, %174 : vector<16x128xf32>
    %176 = arith.mulf %173, %175 : vector<16x128xf32>
    %cst_48 = arith.constant dense<0.000000e+00> : vector<16xf32>
    %177 = vector.multi_reduction <add>, %176, %cst_48 [1] : vector<16x128xf32> to vector<16xf32>
    %178 = vector.shape_cast %177 : vector<16xf32> to vector<16x1xf32>
    %cst_49 = arith.constant 1.280000e+02 : f32
    %179 = vector.broadcast %cst_49 : f32 to vector<16x1xf32>
    %180 = arith.divf %178, %179 : vector<16x1xf32>
    %181 = vector.broadcast %171 : vector<16x1xf32> to vector<16x128xf32>
    %182 = arith.subf %167, %181 : vector<16x128xf32>
    %cst_50 = arith.constant 9.99999974E-6 : f32
    %183 = vector.broadcast %cst_50 : f32 to vector<16x1xf32>
    %184 = arith.addf %180, %183 : vector<16x1xf32>
    %185 = math.rsqrt %184 : vector<16x1xf32>
    %186 = vector.broadcast %185 : vector<16x1xf32> to vector<16x128xf32>
    %187 = arith.mulf %182, %186 : vector<16x128xf32>
    %c0_51 = arith.constant 0 : index
    %c0_52 = arith.constant 0 : index
    %188 = vector.load %arg7[%c0_51, %c0_52] : memref<1x128xf32, #tpu.memory_space<vmem>>, vector<1x128xf32>
    %189 = vector.broadcast %188 : vector<1x128xf32> to vector<16x128xf32>
    %190 = arith.mulf %187, %189 : vector<16x128xf32>
    %c0_53 = arith.constant 0 : index
    %c0_54 = arith.constant 0 : index
    %191 = vector.load %arg8[%c0_53, %c0_54] : memref<1x128xf32, #tpu.memory_space<vmem>>, vector<1x128xf32>
    %192 = vector.broadcast %191 : vector<1x128xf32> to vector<16x128xf32>
    %193 = arith.addf %190, %192 : vector<16x128xf32>
    %194 = vector.shape_cast %193 : vector<16x128xf32> to vector<2x8x128xf32>
    %c0_55 = arith.constant 0 : index
    %c0_56 = arith.constant 0 : index
    %c0_57 = arith.constant 0 : index
    %195 = vector.load %arg9[%c0_55, %c0_56, %c0_57] : memref<2x8x128xf32, #tpu.memory_space<vmem>>, vector<2x8x128xf32>
    tpu.vector_store %arg9[%c0_55, %c0_56, %c0_57], %194 {strides = array<i32>} : memref<2x8x128xf32, #tpu.memory_space<vmem>>, vector<2x8x128xf32>,
    return
  }
  func.func @transform_0(%arg0: i32) -> (i32, i32, i32) {
    %c0_i32 = arith.constant 0 : i32
    %c0_i32_0 = arith.constant 0 : i32
    %c0_i32_1 = arith.constant 0 : i32
    return %arg0, %c0_i32, %c0_i32_0 : i32, i32, i32
  }
  func.func @transform_1(%arg0: i32) -> (i32, i32, i32) {
    %c0_i32 = arith.constant 0 : i32
    %c0_i32_0 = arith.constant 0 : i32
    %c0_i32_1 = arith.constant 0 : i32
    return %arg0, %c0_i32, %c0_i32_0 : i32, i32, i32
  }
  func.func @transform_2(%arg0: i32) -> (i32, i32) {
    %c0_i32 = arith.constant 0 : i32
    %c0_i32_0 = arith.constant 0 : i32
    %c0_i32_1 = arith.constant 0 : i32
    return %c0_i32, %c0_i32_0 : i32, i32
  }
  func.func @transform_3(%arg0: i32) -> (i32, i32) {
    %c0_i32 = arith.constant 0 : i32
    %c0_i32_0 = arith.constant 0 : i32
    %c0_i32_1 = arith.constant 0 : i32
    return %c0_i32, %c0_i32_0 : i32, i32
  }
  func.func @transform_4(%arg0: i32) -> (i32, i32) {
    %c0_i32 = arith.constant 0 : i32
    %c0_i32_0 = arith.constant 0 : i32
    %c0_i32_1 = arith.constant 0 : i32
    return %c0_i32, %c0_i32_0 : i32, i32
  }
  func.func @transform_5(%arg0: i32) -> (i32, i32) {
    %c0_i32 = arith.constant 0 : i32
    %c0_i32_0 = arith.constant 0 : i32
    %c0_i32_1 = arith.constant 0 : i32
    return %c0_i32, %c0_i32_0 : i32, i32
  }
  func.func @transform_6(%arg0: i32) -> (i32, i32) {
    %c0_i32 = arith.constant 0 : i32
    %c0_i32_0 = arith.constant 0 : i32
    %c0_i32_1 = arith.constant 0 : i32
    return %c0_i32, %c0_i32_0 : i32, i32
  }
  func.func @transform_7(%arg0: i32) -> (i32, i32) {
    %c0_i32 = arith.constant 0 : i32
    %c0_i32_0 = arith.constant 0 : i32
    %c0_i32_1 = arith.constant 0 : i32
    return %c0_i32, %c0_i32_0 : i32, i32
  }
  func.func @transform_8(%arg0: i32) -> (i32, i32, i32) {
    %c0_i32 = arith.constant 0 : i32
    %c0_i32_0 = arith.constant 0 : i32
    %c0_i32_1 = arith.constant 0 : i32
    return %arg0, %c0_i32, %c0_i32_0 : i32, i32, i32
  }
}

</mosaic_0001>

<bundles_post_ra>
// kernel: tpu_custom_call.1
= control target key start
LH: loop header
LB: loop body
LE: loop exit
PB: predicated region body
PF: predicated region fallthrough
CT: control target
= control target key end

     0   :  { %13 = vsyncpa [#allocation3], 0  ;;  %s3579_s0 = inlined_call_operand.hbm [shape: f32[2,8,128], index: 0, kind: input, shape index: {}]   ;;  %s3580_s1 = inlined_call_operand.hbm [shape: f32[2,8,128], index: 1, kind: input, shape index: {}]   ;;  %s3581_s2 = inlined_call_operand.hbm [shape: bf16[128,384], index: 2, kind: input, shape index: {}]   ;;  %s3582_s3 = inlined_call_operand.hbm [shape: bf16[128,128], index: 3, kind: input, shape index: {}]   ;;  %s3583_s4 = inlined_call_operand.vmem [shape: f32[1,384], index: 4, kind: input, shape index: {}]   ;;  %s3584_s5 = inlined_call_operand.vmem [shape: f32[1,128], index: 5, kind: input, shape index: {}]   ;;  %s3585_s6 = inlined_call_operand.vmem [shape: f32[1,128], index: 6, kind: input, shape index: {}]   ;;  %s3586_s7 = inlined_call_operand.vmem [shape: f32[1,128], index: 7, kind: input, shape index: {}]   ;;  %s3587_s8 = inlined_call_operand.hbm [shape: f32[2,8,128], index: 8, kind: output, shape index: {}]  }
   0x1   :  { %14 = vsyncpa [#allocation6], 0 }
   0x2   :  { %15 = vsyncpa [#allocation9], 0 }
   0x3   :  { %16 = vsyncpa [#allocation4], 0  ;;  %s3046_s27 = smov [#allocation5]   ;;  %s3047_s29 = smov [#allocation2]  }
   0x4   :  { %s34_s28 = sshll.u32 %s3046_s27, 4  ;;  %s22_s30 = sshll.u32 %s3047_s29, 4  ;;  %s35_s28 = int_to_ptr.vmem [resolvable:$true] %s34_s28  ;;  %s3111_s30 = int_to_ptr.vmem [resolvable:$true] %s22_s30 }
   0x5   :  { %s2928_s11 = scalar_lea.hbm %s3580_s1, 256 }
   0x6   :  { %p2929_p0 = scmp.ne.s32.totalorder %s3580_s1, %s2928_s11  ;;  %p2932_p1 = scmp.lt.u32.totalorder %s2928_s11, %s3580_s1 }
   0x8   :  { %p2934_p2 = pnand %p2932_p1, %p2929_p0 }
   0xa   :  { %2937 = shalt.err (!%p2934_p2)
}
   0xb   :  { %s2938_s16 = scalar_lea.vmem %s35_s28, 256  ;;  %p2943_p4 = scmp.lt.s32.totalorder %s35_s28, %s35_s28 }
   0xc   :  { %p2939_p3 = scmp.ne.s32.totalorder %s35_s28, %s2938_s16  ;;  %p2944_p5 = scmp.lt.s32.totalorder %s2938_s16, %s2938_s16 }
   0xe   :  { %p2945_p6 = por %p2944_p5, %p2943_p4 }
  0x10   :  { %p2946_p7 = pnand %p2945_p6, %p2939_p3 }
  0x12   :  { %2949 = shalt.err (!%p2946_p7)
}
  0x13   :  { %s3048_s17 = smov 128   ;;  %s3049_s18 = smov 8  }
  0x14   :  { %40 = dma.hbm_to_vmem [thread:$0]  %s3580_s1, 256, %s35_s28, [#allocation6], %s3048_s17, %s3048_s17, %s3049_s18  }
  0x15   :  { %s2950_s23 = scalar_lea.hbm %s3579_s0, 256 }
  0x16   :  { %p2951_p8 = scmp.ne.s32.totalorder %s3579_s0, %s2950_s23  ;;  %p2954_p9 = scmp.lt.u32.totalorder %s2950_s23, %s3579_s0 }
  0x18   :  { %p2956_p10 = pnand %p2954_p9, %p2951_p8 }
  0x1a   :  { %2959 = shalt.err (!%p2956_p10)
}
  0x1b   :  { %s2960_s29 = scalar_lea.vmem %s3111_s30, 256  ;;  %p2965_p12 = scmp.lt.s32.totalorder %s3111_s30, %s3111_s30 }
  0x1c   :  { %p2961_p11 = scmp.ne.s32.totalorder %s3111_s30, %s2960_s29  ;;  %p2966_p13 = scmp.lt.s32.totalorder %s2960_s29, %s2960_s29 }
  0x1e   :  { %p2967_p0 = por %p2966_p13, %p2965_p12 }
  0x20   :  { %p2968_p1 = pnand %p2967_p0, %p2961_p11 }
  0x22   :  { %2971 = shalt.err (!%p2968_p1)
}
  0x23   :  { %28 = dma.hbm_to_vmem [thread:$0]  %s3579_s0, 256, %s3111_s30, [#allocation3], %s3048_s17, %s3048_s17, %s3049_s18  }
  0x24   :  { %s3050_s9 = smov [#allocation7]   ;;  %s2972_s13 = scalar_lea.hbm %s3581_s2, 3072 }
  0x25   :  { %s46_s10 = sshll.u32 %s3050_s9, 4  ;;  %p2973_p2 = scmp.ne.s32.totalorder %s3581_s2, %s2972_s13  ;;  %s47_s10 = int_to_ptr.vmem [resolvable:$true] %s46_s10 }
  0x26   :  { %p2976_p3 = scmp.lt.u32.totalorder %s2972_s13, %s3581_s2 }
  0x28   :  { %p2978_p4 = pnand %p2976_p3, %p2973_p2 }
  0x2a   :  { %2981 = shalt.err (!%p2978_p4)
}
  0x2b   :  { %s2982_s20 = scalar_lea.vmem %s47_s10, 3072  ;;  %p2987_p6 = scmp.lt.s32.totalorder %s47_s10, %s47_s10 }
  0x2c   :  { %p2983_p5 = scmp.ne.s32.totalorder %s47_s10, %s2982_s20  ;;  %p2988_p7 = scmp.lt.s32.totalorder %s2982_s20, %s2982_s20 }
  0x2e   :  { %p2989_p8 = por %p2988_p7, %p2987_p6 }
  0x30   :  { %p2990_p9 = pnand %p2989_p8, %p2983_p5 }
  0x32   :  { %2993 = shalt.err (!%p2990_p9)
}
  0x33   :  { %s3051_s0 = smov 192   ;;  %s3052_s30 = smov 12  }
  0x34   :  { %52 = dma.hbm_to_vmem [thread:$0]  %s3581_s2, 3072, %s47_s10, [#allocation6], %s3051_s0, %s3051_s0, %s3052_s30  }
  0x35   :  { %s3053_s23 = smov [#allocation8]   ;;  %s2994_s27 = scalar_lea.hbm %s3582_s3, 1024 }
  0x36   :  { %s58_s24 = sshll.u32 %s3053_s23, 4  ;;  %p2995_p10 = scmp.ne.s32.totalorder %s3582_s3, %s2994_s27  ;;  %s59_s24 = int_to_ptr.vmem [resolvable:$true] %s58_s24 }
  0x37   :  { %p2998_p11 = scmp.lt.u32.totalorder %s2994_s27, %s3582_s3 }
  0x39   :  { %p3000_p12 = pnand %p2998_p11, %p2995_p10 }
  0x3b   :  { %3003 = shalt.err (!%p3000_p12)
}
  0x3c   :  { %s3004_s11 = scalar_lea.vmem %s59_s24, 1024  ;;  %p3009_p0 = scmp.lt.s32.totalorder %s59_s24, %s59_s24 }
  0x3d   :  { %p3005_p13 = scmp.ne.s32.totalorder %s59_s24, %s3004_s11  ;;  %p3010_p1 = scmp.lt.s32.totalorder %s3004_s11, %s3004_s11 }
  0x3f   :  { %p3011_p2 = por %p3010_p1, %p3009_p0 }
  0x41   :  { %p3012_p3 = pnand %p3011_p2, %p3005_p13 }
  0x43   :  { %3015 = shalt.err (!%p3012_p3)
}
  0x44   :  { %s3054_s2 = smov 64   ;;  %s3055_s10 = smov 4  }
  0x45   :  { %64 = dma.hbm_to_vmem [thread:$0]  %s3582_s3, 1024, %s59_s24, [#allocation9], %s3054_s2, %s3054_s2, %s3055_s10  }
  0x46   :  { %3038 = dma.done.wait [#allocation3], 256  }
  0x47   :  { %3039 = vsyncadd [#allocation3], 4294967040 }
  0x48   :  { %3040 = dma.done.wait [#allocation6], 3328  }
  0x49   :  { %3041 = vsyncadd [#allocation6], 4294963968 }
  0x4a   :  { %3042 = dma.done.wait [#allocation9], 1024  }
  0x4b   :  { %3043 = vsyncadd [#allocation9], 4294966272  ;;  %v3056_v0 = vmov 0   ;;  %v2818_v1 = vld [vmem:[#allocation7 + $0x4] ss:$12 sps:$4 sm:$0xff]   ;;  %v87_v10 = vld [vmem:[#allocation2 + $0x8] sm:$0xff]  ;;  %v126_v24 = vlaneseq }
  0x4c   :  { %301 = vmatprep.mubr.bf16.mxu0 %v3056_v0  ;;  %v2820_v2 = vld [vmem:[#allocation7] ss:$12 sps:$4 sm:$0xff]   ;;  %269 = vmatprep.subr.bf16.mxu0 %v2818_v1  ;;  %v2821_v3 = vld [vmem:[#allocation7 + $0x1c] ss:$12 sps:$4 sm:$0xff]   ;;  %v2823_v4 = vld [vmem:[#allocation7 + $0x18] ss:$12 sps:$4 sm:$0xff]  }
  0x4d   :  { %270 = vmatpush1.bf16.msra.mxu0 %v2820_v2  ;;  %v2824_v5 = vld [vmem:[#allocation7 + $0x34] ss:$12 sps:$4 sm:$0xff]   ;;  %v2826_v6 = vld [vmem:[#allocation7 + $0x30] ss:$12 sps:$4 sm:$0xff]   ;;  %v2827_v7 = vld [vmem:[#allocation7 + $0x4c] ss:$12 sps:$4 sm:$0xff]  }
  0x4e   :  { %271 = vmatprep.subr.bf16.mxu0 %v2821_v3  ;;  %v86_v8 = vld [vmem:[#allocation2] sm:$0xff]  ;;  %v2829_v9 = vld [vmem:[#allocation7 + $0x48] ss:$12 sps:$4 sm:$0xff]   ;;  %v2838_v17 = vld [vmem:[#allocation7 + $0x90] ss:$12 sps:$4 sm:$0xff]   ;;  %v3057_v23 = vmov 0.0  }
  0x4f   :  { %v2830_v11 = vld [vmem:[#allocation7 + $0x64] ss:$12 sps:$4 sm:$0xff]   ;;  %v90_v12 = vpack.c.bf16 %v87_v10, %v86_v8  ;;  %v2832_v13 = vld [vmem:[#allocation7 + $0x60] ss:$12 sps:$4 sm:$0xff]   ;;  %v2833_v14 = vld [vmem:[#allocation7 + $0x7c] ss:$12 sps:$4 sm:$0xff]  }
  0x50   :  { %v2835_v15 = vld [vmem:[#allocation7 + $0x78] ss:$12 sps:$4 sm:$0xff]   ;;  %v2836_v16 = vld [vmem:[#allocation7 + $0x94] ss:$12 sps:$4 sm:$0xff]   ;;  %vm3058_vm0 = vmmov 0   ;;  %v3180_v25 = vshrl.u32 %v126_v24, 7 }
  0x51   :  { %272 = vmatpush1.bf16.msra.mxu0 %v2823_v4  ;;  %2547 = vmatprep.mubr.bf16.mxu1 %v90_v12  ;;  %v2839_v18 = vld [vmem:[#allocation7 + $0xac] ss:$12 sps:$4 sm:$0xff]   ;;  %v2841_v19 = vld [vmem:[#allocation7 + $0xa8] ss:$12 sps:$4 sm:$0xff]   ;;  %v3186_v31 = vld [vmem:[%s3583_s4] sm:$0x7] }
  0x52   :  { %273 = vmatprep.subr.bf16.mxu0 %v2824_v5  ;;  %v88_v20 = vld [vmem:[#allocation5] sm:$0xff]  ;;  %v89_v21 = vld [vmem:[#allocation5 + $0x8] sm:$0xff]  ;;  %v132_v29 = vsub.s32 1, %v3180_v25  ;;  %v128_v33 = vsub.s32 0, %v3180_v25  ;;  %vm371_vm1 = vcmask 130048   ;;  %s3059_s4 = smov 112  }
  0x53   :  { %v3174_v22 = vpack.c.bf16 %v89_v21, %v88_v20  ;;  %v2842_v49 = vld [vmem:[#allocation7 + $0x8] ss:$12 sps:$4 sm:$0xff]   ;;  %v2843_v50 = vld [vmem:[#allocation7 + $0x20] ss:$12 sps:$4 sm:$0xff]   ;;  %v2844_v51 = vld [vmem:[#allocation7 + $0x38] ss:$12 sps:$4 sm:$0xff]  }
  0x54   :  { %v133_v32 = vrot.slane %v3186_v31, %v132_v29  ;;  %v129_v39 = vrot.slane %v3186_v31, %v128_v33  ;;  %2531 = vmatprep.subr.bf16.mxu1 %v2842_v49  ;;  %v2845_v52 = vld [vmem:[#allocation7 + $0x50] ss:$12 sps:$4 sm:$0xff]   ;;  %v2846_v53 = vld [vmem:[#allocation7 + $0x68] ss:$12 sps:$4 sm:$0xff]   ;;  %v2847_v54 = vld [vmem:[#allocation7 + $0x80] ss:$12 sps:$4 sm:$0xff]  }
  0x55   :  { %274 = vmatpush1.bf16.msra.mxu0 %v2826_v6  ;;  %2532 = vmatpush3.bf16.msra.mxu1 %v2842_v49  ;;  %v2848_v55 = vld [vmem:[#allocation7 + $0x98] ss:$12 sps:$4 sm:$0xff]   ;;  %v2849_v56 = vld [vmem:[#allocation7 + $0xb0] ss:$12 sps:$4 sm:$0xff]   ;;  %vm464_vm2 = vcmask 64512   ;;  %vm492_vm3 = vcmask 1043456  }
  0x56   :  { %275 = vmatprep.subr.bf16.mxu0 %v2827_v7  ;;  %2533 = vmatprep.subr.bf16.mxu1 %v2843_v50  ;;  %s3060_s15 = smov 96   ;;  %s3061_s16 = smov 80   ;;  %vm2186_vm4 = vcmask 261120   ;;  %vm2189_vm5 = vcmask 392192   ;;  %vm2192_vm6 = vcmask 523264   ;;  %vm2195_vm7 = vcmask 654336  }
  0x57   :  { %s3062_s19 = smov 48   ;;  %s3063_s20 = smov 32   ;;  %vm2198_vm8 = vcmask 785408   ;;  %vm2201_vm9 = vcmask 916480  }
  0x58   :  { %s3064_s0 = smov 16   ;;  %s3065_s25 = smov [#allocation10]  }
  0x59   :  { %276 = vmatpush1.bf16.msra.mxu0 %v2829_v9  ;;  %2534 = vmatpush3.bf16.msra.mxu1 %v2843_v50  ;;  %s2367_s26 = sshll.u32 %s3065_s25, 4  ;;  %s2368_s26 = int_to_ptr.vmem [resolvable:$true] %s2367_s26 }
  0x5a   :  { %277 = vmatprep.subr.bf16.mxu0 %v2830_v11  ;;  %2535 = vmatprep.subr.bf16.mxu1 %v2844_v51  ;;  %s3016_s27 = scalar_lea.vmem %s2368_s26, 256  ;;  %p3021_p5 = scmp.lt.s32.totalorder %s2368_s26, %s2368_s26 }
  0x5b   :  { %p3017_p4 = scmp.ne.s32.totalorder %s2368_s26, %s3016_s27  ;;  %p3022_p6 = scmp.lt.s32.totalorder %s3016_s27, %s3016_s27 }
  0x5d   :  { %278 = vmatpush1.bf16.msra.mxu0 %v2832_v13  ;;  %2536 = vmatpush3.bf16.msra.mxu1 %v2844_v51  ;;  %v136_v13 = vsub.s32 2, %v3180_v25  ;;  %p3023_p7 = por %p3022_p6, %p3021_p5 }
  0x5e   :  { %279 = vmatprep.subr.bf16.mxu0 %v2833_v14  ;;  %2537 = vmatprep.subr.bf16.mxu1 %v2845_v52 }
  0x5f   :  { %v137_v14 = vrot.slane %v3186_v31, %v136_v13  ;;  %p3024_p8 = pnand %p3023_p7, %p3017_p4 }
  0x61   :  { %280 = vmatpush1.bf16.msra.mxu0 %v2835_v15  ;;  %2538 = vmatpush3.bf16.msra.mxu1 %v2845_v52 }
  0x62   :  { %281 = vmatprep.subr.bf16.mxu0 %v2836_v16  ;;  %2539 = vmatprep.subr.bf16.mxu1 %v2846_v53 }
  0x65   :  { %282 = vmatpush1.bf16.msra.mxu0 %v2838_v17  ;;  %2540 = vmatpush3.bf16.msra.mxu1 %v2846_v53 }
  0x66   :  { %283 = vmatprep.subr.bf16.mxu0 %v2839_v18  ;;  %2541 = vmatprep.subr.bf16.mxu1 %v2847_v54 }
  0x69   :  { %284 = vmatpush1.bf16.msra.mxu0 %v2841_v19  ;;  %2542 = vmatpush3.bf16.msra.mxu1 %v2847_v54 }
  0x6a   :  { %2551 = vmatprep.subr.bf16.mxu0 %v3057_v23  ;;  %2543 = vmatprep.subr.bf16.mxu1 %v2848_v55 }
  0x6c   :  { %302 = vmatmul.mubr.bf16.vlgmr.msra.gmra.mrb[0].mxu0 %v90_v12 }
  0x6d   :  { %309 = vmatprep.mubr.bf16.mxu0 %v3056_v0  ;;  %2544 = vmatpush3.bf16.msra.mxu1 %v2848_v55 }
  0x6e   :  { %2545 = vmatprep.subr.bf16.mxu1 %v2849_v56 }
  0x71   :  { %2546 = vmatpush3.bf16.msra.mxu1 %v2849_v56 }
  0x72   :  { %2563 = vmatprep.subr.bf16.mxu1 %v3057_v23 }
  0x74   :  { %310 = vmatmul.mubr.bf16.gmra.mrb[4].mxu0 %v3174_v22  ;;  %2548 = vmatmul.mubr.bf16.vlgmr.msra.gmra.mrb[0].mxu1 %v3174_v22 }
  0x75   :  { %2553 = vmatprep.mubr.msk.bf16.mxu0 %vm3058_vm0, %v3057_v23  ;;  %2565 = vmatprep.mubr.msk.bf16.mxu1 %vm3058_vm0, %v3057_v23 }
 0x13f   :  { %v303_v26 = vpop.f32.mrb[0].mxu0 }
 0x140   :  { %v305_v27 = vpop.f32.mrb[1].mxu0  ;;  %v304_v44 = vadd.f32 %v303_v26, %v129_v39 }
 0x141   :  { %v306_v28 = vpop.f32.mrb[2].mxu0 }
 0x142   :  { %v308_v30 = vpop.f32.mrb[3].mxu0  ;;  %v3200_v45 = vpack.c.bf16 %v304_v44, %v304_v44  ;;  %v307_v47 = vadd.f32 %v306_v28, %v129_v39 }
 0x144   :  { %v3209_v48 = vpack.c.bf16 %v307_v47, %v307_v47 }
 0x147   :  { %v311_v34 = vpop.f32.mrb[4].mxu0  ;;  %v2549_v15 = vpop.f32.mrb[0].mxu1 }
 0x148   :  { %v312_v35 = vpop.f32.mrb[5].mxu0  ;;  %v359_v16 = vadd.f32 %v2549_v15, %v137_v14  ;;  %v352_v17 = vpop.f32.mrb[1].mxu1 }
 0x149   :  { %v313_v36 = vadd.f32 %v312_v35, %v133_v32  ;;  %v314_v37 = vpop.f32.mrb[6].mxu0  ;;  %v2550_v19 = vpop.f32.mrb[2].mxu1 }
 0x14a   :  { %v315_v38 = vpop.f32.mrb[7].mxu0  ;;  %v3227_v18 = vpack.c.bf16 %v359_v16, %v359_v16  ;;  %v354_v21 = vpop.f32.mrb[3].mxu1  ;;  %v362_v22 = vadd.f32 %v2550_v19, %v137_v14 }
 0x14b   :  { %v3191_v40 = vpack.c.bf16 %v313_v36, %v313_v36  ;;  %v316_v41 = vadd.f32 %v315_v38, %v133_v32 }
 0x14c   :  { %v494_v20 = vsel %vm492_vm3, %v3227_v18, 0  ;;  %v3232_v24 = vpack.c.bf16 %v362_v22, %v362_v22 }
 0x14d   :  { %v3193_v42 = vpack.c.bf16 %v316_v41, %v316_v41  ;;  %v376_v43 = vsel %vm371_vm1, %v3191_v40, 0  ;;  %2564 = vmatpush3.bf16.msra.mxu1 %v494_v20 }
 0x14e   :  { %2552 = vmatpush3.bf16.xpose.msra.mxu0 %v376_v43  ;;  %2575 = vmatprep.subr.bf16.mxu1 %v3057_v23  ;;  %v540_v25 = vsel %vm492_vm3, %v3232_v24, 0 }
 0x14f   :  { %638 = vrot.lane.b32.xlu1 %v3193_v42, %s3059_s4  ;;  %2557 = vmatprep.subr.bf16.mxu0 %v3057_v23  ;;  %v422_v46 = vsel %vm371_vm1, %v3193_v42, 0 }
 0x155   :  { %2554 = vmatmul.mubr.msk.bf16.vlgmr.msra.gmra.mrb[8].mxu0 %vm371_vm1, %v3200_v45 }
 0x156   :  { %2558 = vmatpush3.bf16.xpose.msra.mxu0 %v422_v46  ;;  %2559 = vmatprep.mubr.msk.bf16.mxu0 %vm3058_vm0, %v3057_v23 }
 0x157   :  { %2569 = vmatprep.subr.bf16.mxu0 %v3057_v23 }
 0x15d   :  { %2560 = vmatmul.mubr.msk.bf16.vlgmr.msra.gmra.mrb[12].mxu0 %vm371_vm1, %v3209_v48 }
 0x15e   :  { %2571 = vmatprep.mubr.msk.bf16.mxu0 %vm3058_vm0, %v3057_v23  ;;  %2570 = vmatpush3.bf16.msra.mxu0 %v540_v25 }
 0x15f   :  { %2581 = vmatprep.subr.bf16.mxu0 %v3057_v23 }
 0x1c1   :  { %v639_v26 = vpop.permute.xlu1 %638 }
 0x1c2   :  { %v644_v38 = vsel %vm371_vm1, %v639_v26, 0 }
 0x228   :  { %v412_v57 = vpop.f32.mrb[8].mxu0 }
 0x229   :  { %v2555_v58 = vpop.f32.mrb[9].mxu0  ;;  %v465_v59 = vsel %vm464_vm2, %v412_v57, -inf }
 0x22a   :  { %466 = vmax.xlane.f32.xlu0 %v465_v59  ;;  %v415_v60 = vpop.f32.mrb[10].mxu0 }
 0x22b   :  { %v2556_v61 = vpop.f32.mrb[11].mxu0 }
 0x230   :  { %v458_v62 = vpop.f32.mrb[12].mxu0 }
 0x231   :  { %v2561_v63 = vpop.f32.mrb[13].mxu0  ;;  %v468_v0 = vsel %vm464_vm2, %v458_v62, -inf }
 0x232   :  { %469 = vmax.xlane.f32.xlu0 %v468_v0  ;;  %v461_v1 = vpop.f32.mrb[14].mxu0 }
 0x233   :  { %v2562_v2 = vpop.f32.mrb[15].mxu0 }
 0x248   :  { %586 = vrot.lane.b32.xlu0 %v3191_v40, %s3059_s4 }
 0x2b7   :  { %v467_v3 = vpop.xlane.xlu0 %466 }
 0x2b8   :  { %v471_v4 = vsub.f32 %v412_v57, %v467_v3 }
 0x2ba   :  { %v473_v5 = vmul.f32 1.442695, %v471_v4 }
 0x2bc   :  { %2858 = vpow2.f32 %v473_v5 }
 0x2bf   :  { %v470_v6 = vpop.xlane.xlu0 %469 }
 0x2c0   :  { %v472_v7 = vsub.f32 %v458_v62, %v470_v6 }
 0x2c2   :  { %v475_v8 = vmul.f32 1.442695, %v472_v7 }
 0x2c3   :  { %v587_v31 = vpop.permute.xlu0 %586 }
 0x2c4   :  { %2860 = vpow2.f32 %v475_v8  ;;  %v592_v33 = vsel %vm371_vm1, %v587_v31, 0 }
 0x2c6   :  { %v2859_v9 = vpop.eup %2858 }
 0x2c7   :  { %v477_v10 = vsel %vm464_vm2, %v2859_v9, 0.0 }
 0x2c8   :  { %478 = vadd.xlane.f32.xlu1 %v477_v10 }
 0x2ce   :  { %v2861_v11 = vpop.eup %2860 }
 0x2cf   :  { %v480_v12 = vsel %vm464_vm2, %v2861_v11, 0.0 }
 0x2d0   :  { %481 = vadd.xlane.f32.xlu1 %v480_v12 }
 0x2e1   :  { %583 = vrot.lane.b32.xlu1 %v3200_v45, %s3059_s4 }
 0x2e5   :  { %635 = vrot.lane.b32.xlu1 %v3209_v48, %s3059_s4 }
 0x355   :  { %v479_v27 = vpop.xlane.xlu1 %478 }
 0x356   :  { %2862 = vrcp.f32 %v479_v27 }
 0x35d   :  { %v482_v28 = vpop.xlane.xlu1 %481 }
 0x35e   :  { %2864 = vrcp.f32 %v482_v28 }
 0x360   :  { %v2863_v29 = vpop.eup %2862 }
 0x361   :  { %v484_v30 = vmul.f32 %v2863_v29, %v2859_v9  ;;  %v584_v37 = vpop.permute.xlu1 %583 }
 0x363   :  { %v487_v32 = vpack.c.bf16 %v484_v30, %v484_v30 }
 0x365   :  { %2566 = vmatmul.mubr.msk.bf16.vlgmr.msra.gmra.mrb[4].mxu1 %vm464_vm2, %v487_v32  ;;  %v636_v39 = vpop.permute.xlu1 %635 }
 0x366   :  { %2576 = vmatpush3.bf16.xpose.msra.mxu1 %v592_v33  ;;  %2577 = vmatprep.mubr.msk.bf16.mxu1 %vm3058_vm0, %v3057_v23 }
 0x367   :  { %2587 = vmatprep.subr.bf16.mxu1 %v3057_v23 }
 0x368   :  { %v2865_v34 = vpop.eup %2864 }
 0x369   :  { %v486_v35 = vmul.f32 %v2865_v34, %v2861_v11 }
 0x36b   :  { %v488_v36 = vpack.c.bf16 %v486_v35, %v486_v35 }
 0x36d   :  { %2572 = vmatmul.mubr.msk.bf16.vlgmr.msra.gmra.mrb[16].mxu0 %vm464_vm2, %v488_v36  ;;  %2578 = vmatmul.mubr.msk.bf16.vlgmr.msra.gmra.mrb[8].mxu1 %vm371_vm1, %v584_v37 }
 0x36e   :  { %2582 = vmatpush3.bf16.xpose.msra.mxu0 %v644_v38  ;;  %2583 = vmatprep.mubr.msk.bf16.mxu0 %vm3058_vm0, %v3057_v23 }
 0x36f   :  { %2593 = vmatprep.subr.bf16.mxu0 %v3057_v23  ;;  %2589 = vmatprep.mubr.msk.bf16.mxu1 %vm3058_vm0, %v3057_v23 }
 0x375   :  { %2584 = vmatmul.mubr.msk.bf16.vlgmr.msra.gmra.mrb[20].mxu0 %vm371_vm1, %v636_v39 }
 0x376   :  { %2595 = vmatprep.mubr.msk.bf16.mxu0 %vm3058_vm0, %v3057_v23 }
 0x438   :  { %v3257_v41 = vpop.f32.mrb[4].mxu1 }
 0x439   :  { %v2567_v43 = vpop.f32.mrb[5].mxu1 }
 0x43a   :  { %v533_v44 = vpop.f32.mrb[6].mxu1 }
 0x43b   :  { %v2568_v46 = vpop.f32.mrb[7].mxu1 }
 0x440   :  { %v3259_v47 = vpop.f32.mrb[16].mxu0  ;;  %v628_v49 = vpop.f32.mrb[8].mxu1 }
 0x441   :  { %v2573_v50 = vpop.f32.mrb[17].mxu0  ;;  %v2579_v51 = vpop.f32.mrb[9].mxu1  ;;  %v686_v52 = vsel %vm464_vm2, %v628_v49, -inf }
 0x442   :  { %687 = vmax.xlane.f32.xlu0 %v686_v52  ;;  %v579_v53 = vpop.f32.mrb[18].mxu0  ;;  %v631_v54 = vpop.f32.mrb[10].mxu1 }
 0x443   :  { %v2574_v55 = vpop.f32.mrb[19].mxu0  ;;  %v2580_v56 = vpop.f32.mrb[11].mxu1 }
 0x448   :  { %v680_v57 = vpop.f32.mrb[20].mxu0 }
 0x449   :  { %v2585_v58 = vpop.f32.mrb[21].mxu0  ;;  %v689_v59 = vsel %vm464_vm2, %v680_v57, -inf }
 0x44a   :  { %690 = vmax.xlane.f32.xlu1 %v689_v59  ;;  %v683_v60 = vpop.f32.mrb[22].mxu0 }
 0x44b   :  { %v2586_v61 = vpop.f32.mrb[23].mxu0 }
 0x45b   :  { %760 = vrot.lane.b32.xlu1 %v3232_v24, %s3059_s4 }
 0x45f   :  { %810 = vrot.lane.b32.xlu1 %v3191_v40, %s3060_s15 }
 0x463   :  { %860 = vrot.lane.b32.xlu1 %v3193_v42, %s3060_s15 }
 0x467   :  { %858 = vrot.lane.b32.xlu1 %v3209_v48, %s3060_s15 }
 0x4cf   :  { %v688_v62 = vpop.xlane.xlu0 %687 }
 0x4d0   :  { %v692_v63 = vsub.f32 %v628_v49, %v688_v62 }
 0x4d2   :  { %v694_v0 = vmul.f32 1.442695, %v692_v63 }
 0x4d4   :  { %2866 = vpow2.f32 %v694_v0 }
 0x4d7   :  { %v691_v1 = vpop.xlane.xlu1 %690 }
 0x4d8   :  { %v693_v2 = vsub.f32 %v680_v57, %v691_v1 }
 0x4da   :  { %v696_v3 = vmul.f32 1.442695, %v693_v2 }
 0x4db   :  { %v761_v4 = vpop.permute.xlu1 %760 }
 0x4dc   :  { %2868 = vpow2.f32 %v696_v3  ;;  %v766_v5 = vsel %vm492_vm3, %v761_v4, 0 }
 0x4dd   :  { %2594 = vmatpush3.bf16.msra.mxu0 %v766_v5 }
 0x4de   :  { %v2867_v6 = vpop.eup %2866  ;;  %2605 = vmatprep.subr.bf16.mxu0 %v3057_v23 }
 0x4df   :  { %v698_v7 = vsel %vm464_vm2, %v2867_v6, 0.0  ;;  %v811_v17 = vpop.permute.xlu1 %810 }
 0x4e0   :  { %699 = vadd.xlane.f32.xlu0 %v698_v7  ;;  %v816_v22 = vsel %vm371_vm1, %v811_v17, 0 }
 0x4e3   :  { %v861_v21 = vpop.permute.xlu1 %860 }
 0x4e4   :  { %v866_v26 = vsel %vm371_vm1, %v861_v21, 0 }
 0x4e6   :  { %v2869_v8 = vpop.eup %2868 }
 0x4e7   :  { %v701_v9 = vsel %vm464_vm2, %v2869_v8, 0.0  ;;  %v859_v28 = vpop.permute.xlu1 %858 }
 0x4e8   :  { %702 = vadd.xlane.f32.xlu0 %v701_v9 }
 0x4fe   :  { %711 = vrot.lane.b32.xlu0 %v3227_v18, %s3059_s4 }
 0x502   :  { %808 = vrot.lane.b32.xlu0 %v3200_v45, %s3060_s15 }
 0x56d   :  { %v700_v10 = vpop.xlane.xlu0 %699 }
 0x56e   :  { %2870 = vrcp.f32 %v700_v10 }
 0x575   :  { %v703_v11 = vpop.xlane.xlu0 %702 }
 0x576   :  { %2872 = vrcp.f32 %v703_v11 }
 0x578   :  { %v2871_v12 = vpop.eup %2870 }
 0x579   :  { %v705_v13 = vmul.f32 %v2871_v12, %v2867_v6  ;;  %v712_v14 = vpop.permute.xlu0 %711 }
 0x57a   :  { %v717_v15 = vsel %vm492_vm3, %v712_v14, 0 }
 0x57b   :  { %2588 = vmatpush3.bf16.msra.mxu1 %v717_v15  ;;  %v708_v16 = vpack.c.bf16 %v705_v13, %v705_v13 }
 0x57c   :  { %2599 = vmatprep.subr.bf16.mxu1 %v3057_v23 }
 0x57d   :  { %v809_v27 = vpop.permute.xlu0 %808 }
 0x57e   :  { %2590 = vmatmul.mubr.msk.bf16.vlgmr.msra.gmra.mrb[12].mxu1 %vm464_vm2, %v708_v16 }
 0x57f   :  { %2601 = vmatprep.mubr.msk.bf16.mxu1 %vm3058_vm0, %v3057_v23 }
 0x580   :  { %v2873_v19 = vpop.eup %2872 }
 0x581   :  { %v707_v20 = vmul.f32 %v2873_v19, %v2869_v8 }
 0x583   :  { %v709_v25 = vpack.c.bf16 %v707_v20, %v707_v20 }
 0x584   :  { %2600 = vmatpush3.bf16.xpose.msra.mxu1 %v816_v22 }
 0x585   :  { %2596 = vmatmul.mubr.msk.bf16.vlgmr.msra.gmra.mrb[24].mxu0 %vm464_vm2, %v709_v25  ;;  %2611 = vmatprep.subr.bf16.mxu1 %v3057_v23 }
 0x586   :  { %2606 = vmatpush3.bf16.xpose.msra.mxu0 %v866_v26  ;;  %2607 = vmatprep.mubr.msk.bf16.mxu0 %vm3058_vm0, %v3057_v23 }
 0x587   :  { %2617 = vmatprep.subr.bf16.mxu0 %v3057_v23 }
 0x58b   :  { %2602 = vmatmul.mubr.msk.bf16.vlgmr.msra.gmra.mrb[16].mxu1 %vm371_vm1, %v809_v27 }
 0x58c   :  { %2613 = vmatprep.mubr.msk.bf16.mxu1 %vm3058_vm0, %v3057_v23 }
 0x58d   :  { %2608 = vmatmul.mubr.msk.bf16.vlgmr.msra.gmra.mrb[28].mxu0 %vm371_vm1, %v859_v28 }
 0x58e   :  { %2619 = vmatprep.mubr.msk.bf16.mxu0 %vm3058_vm0, %v3057_v23 }
 0x651   :  { %v3297_v29 = vpop.f32.mrb[12].mxu1 }
 0x652   :  { %v2591_v30 = vpop.f32.mrb[13].mxu1 }
 0x653   :  { %v756_v31 = vpop.f32.mrb[14].mxu1 }
 0x654   :  { %v2592_v32 = vpop.f32.mrb[15].mxu1 }
 0x658   :  { %v3299_v33 = vpop.f32.mrb[24].mxu0 }
 0x659   :  { %v2783_v34 = vpack.i.bf16 %v3299_v33, %v3297_v29  ;;  %v2597_v35 = vpop.f32.mrb[25].mxu0 }
 0x65a   :  { %v805_v36 = vpop.f32.mrb[26].mxu0 }
 0x65b   :  { %v2598_v37 = vpop.f32.mrb[27].mxu0 }
 0x65e   :  { %v852_v38 = vpop.f32.mrb[16].mxu1 }
 0x65f   :  { %v2603_v39 = vpop.f32.mrb[17].mxu1  ;;  %v908_v43 = vsel %vm464_vm2, %v852_v38, -inf }
 0x660   :  { %909 = vmax.xlane.f32.xlu0 %v908_v43  ;;  %v855_v44 = vpop.f32.mrb[18].mxu1  ;;  %v902_v46 = vpop.f32.mrb[28].mxu0 }
 0x661   :  { %v2604_v49 = vpop.f32.mrb[19].mxu1  ;;  %v2609_v50 = vpop.f32.mrb[29].mxu0  ;;  %v911_v51 = vsel %vm464_vm2, %v902_v46, -inf }
 0x662   :  { %912 = vmax.xlane.f32.xlu1 %v911_v51  ;;  %v905_v52 = vpop.f32.mrb[30].mxu0 }
 0x663   :  { %v2610_v53 = vpop.f32.mrb[31].mxu0 }
 0x673   :  { %980 = vrot.lane.b32.xlu1 %v3232_v24, %s3060_s15 }
 0x677   :  { %1030 = vrot.lane.b32.xlu1 %v3191_v40, %s3061_s16 }
 0x67b   :  { %1080 = vrot.lane.b32.xlu1 %v3193_v42, %s3061_s16 }
 0x67f   :  { %1078 = vrot.lane.b32.xlu1 %v3209_v48, %s3061_s16 }
 0x6ed   :  { %v910_v54 = vpop.xlane.xlu0 %909 }
 0x6ee   :  { %v914_v55 = vsub.f32 %v852_v38, %v910_v54 }
 0x6ef   :  { %v913_v56 = vpop.xlane.xlu1 %912 }
 0x6f0   :  { %v916_v57 = vmul.f32 1.442695, %v914_v55  ;;  %v915_v58 = vsub.f32 %v902_v46, %v913_v56 }
 0x6f2   :  { %2874 = vpow2.f32 %v916_v57  ;;  %v918_v59 = vmul.f32 1.442695, %v915_v58 }
 0x6f3   :  { %v981_v60 = vpop.permute.xlu1 %980 }
 0x6f4   :  { %2876 = vpow2.f32 %v918_v59  ;;  %v986_v61 = vsel %vm492_vm3, %v981_v60, 0 }
 0x6f5   :  { %2618 = vmatpush3.bf16.msra.mxu0 %v986_v61 }
 0x6f6   :  { %2629 = vmatprep.subr.bf16.mxu0 %v3057_v23 }
 0x6f7   :  { %v1031_v7 = vpop.permute.xlu1 %1030 }
 0x6f8   :  { %v1036_v13 = vsel %vm371_vm1, %v1031_v7, 0 }
 0x6fb   :  { %v1081_v12 = vpop.permute.xlu1 %1080 }
 0x6fc   :  { %v2875_v62 = vpop.eup %2874  ;;  %v1086_v15 = vsel %vm371_vm1, %v1081_v12, 0 }
 0x6fd   :  { %v920_v63 = vsel %vm464_vm2, %v2875_v62, 0.0 }
 0x6fe   :  { %v2877_v0 = vpop.eup %2876  ;;  %921 = vadd.xlane.f32.xlu0 %v920_v63 }
 0x6ff   :  { %v923_v1 = vsel %vm464_vm2, %v2877_v0, 0.0  ;;  %v1079_v17 = vpop.permute.xlu1 %1078 }
 0x702   :  { %924 = vadd.xlane.f32.xlu0 %v923_v1 }
 0x718   :  { %932 = vrot.lane.b32.xlu0 %v3227_v18, %s3060_s15 }
 0x71c   :  { %1028 = vrot.lane.b32.xlu0 %v3200_v45, %s3061_s16 }
 0x78b   :  { %v922_v2 = vpop.xlane.xlu0 %921 }
 0x78c   :  { %2878 = vrcp.f32 %v922_v2 }
 0x78f   :  { %v925_v3 = vpop.xlane.xlu0 %924 }
 0x790   :  { %2880 = vrcp.f32 %v925_v3 }
 0x793   :  { %v933_v4 = vpop.permute.xlu0 %932 }
 0x794   :  { %v938_v5 = vsel %vm492_vm3, %v933_v4, 0 }
 0x795   :  { %2612 = vmatpush3.bf16.msra.mxu1 %v938_v5 }
 0x796   :  { %v2879_v6 = vpop.eup %2878  ;;  %2623 = vmatprep.subr.bf16.mxu1 %v3057_v23 }
 0x797   :  { %v927_v8 = vmul.f32 %v2879_v6, %v2875_v62  ;;  %v1029_v16 = vpop.permute.xlu0 %1028 }
 0x799   :  { %v930_v9 = vpack.c.bf16 %v927_v8, %v927_v8 }
 0x79a   :  { %v2881_v10 = vpop.eup %2880 }
 0x79b   :  { %v929_v11 = vmul.f32 %v2881_v10, %v2877_v0  ;;  %2614 = vmatmul.mubr.msk.bf16.vlgmr.msra.gmra.mrb[20].mxu1 %vm464_vm2, %v930_v9 }
 0x79c   :  { %2625 = vmatprep.mubr.msk.bf16.mxu1 %vm3058_vm0, %v3057_v23 }
 0x79d   :  { %v931_v14 = vpack.c.bf16 %v929_v11, %v929_v11 }
 0x79e   :  { %2624 = vmatpush3.bf16.xpose.msra.mxu1 %v1036_v13 }
 0x79f   :  { %2620 = vmatmul.mubr.msk.bf16.vlgmr.msra.gmra.mrb[32].mxu0 %vm464_vm2, %v931_v14  ;;  %2635 = vmatprep.subr.bf16.mxu1 %v3057_v23 }
 0x7a0   :  { %2630 = vmatpush3.bf16.xpose.msra.mxu0 %v1086_v15  ;;  %2631 = vmatprep.mubr.msk.bf16.mxu0 %vm3058_vm0, %v3057_v23 }
 0x7a1   :  { %2641 = vmatprep.subr.bf16.mxu0 %v3057_v23 }
 0x7a5   :  { %2626 = vmatmul.mubr.msk.bf16.vlgmr.msra.gmra.mrb[24].mxu1 %vm371_vm1, %v1029_v16 }
 0x7a6   :  { %2637 = vmatprep.mubr.msk.bf16.mxu1 %vm3058_vm0, %v3057_v23 }
 0x7a7   :  { %2632 = vmatmul.mubr.msk.bf16.vlgmr.msra.gmra.mrb[36].mxu0 %vm371_vm1, %v1079_v17 }
 0x7a8   :  { %2643 = vmatprep.mubr.msk.bf16.mxu0 %vm3058_vm0, %v3057_v23 }
 0x86e   :  { %v3339_v19 = vpop.f32.mrb[20].mxu1 }
 0x86f   :  { %v2615_v20 = vpop.f32.mrb[21].mxu1 }
 0x870   :  { %v977_v21 = vpop.f32.mrb[22].mxu1 }
 0x871   :  { %v2616_v22 = vpop.f32.mrb[23].mxu1 }
 0x872   :  { %v3341_v25 = vpop.f32.mrb[32].mxu0 }
 0x873   :  { %v2788_v26 = vpack.i.bf16 %v3341_v25, %v3339_v19  ;;  %v2621_v27 = vpop.f32.mrb[33].mxu0 }
 0x874   :  { %v1025_v28 = vpop.f32.mrb[34].mxu0 }
 0x875   :  { %v2622_v30 = vpop.f32.mrb[35].mxu0 }
 0x878   :  { %v1072_v31 = vpop.f32.mrb[24].mxu1 }
 0x879   :  { %v2627_v32 = vpop.f32.mrb[25].mxu1  ;;  %v1128_v35 = vsel %vm464_vm2, %v1072_v31, -inf }
 0x87a   :  { %1129 = vmax.xlane.f32.xlu0 %v1128_v35  ;;  %v1075_v36 = vpop.f32.mrb[26].mxu1  ;;  %v1122_v37 = vpop.f32.mrb[36].mxu0 }
 0x87b   :  { %v2628_v38 = vpop.f32.mrb[27].mxu1  ;;  %v2633_v39 = vpop.f32.mrb[37].mxu0  ;;  %v1131_v43 = vsel %vm464_vm2, %v1122_v37, -inf }
 0x87c   :  { %1132 = vmax.xlane.f32.xlu1 %v1131_v43  ;;  %v1125_v44 = vpop.f32.mrb[38].mxu0 }
 0x87d   :  { %v2634_v46 = vpop.f32.mrb[39].mxu0 }
 0x88d   :  { %1200 = vrot.lane.b32.xlu1 %v3232_v24, %s3061_s16 }
 0x891   :  { %1250 = vrot.lane.b32.xlu1 %v3191_v40, %s3054_s2 }
 0x895   :  { %1300 = vrot.lane.b32.xlu1 %v3193_v42, %s3054_s2 }
 0x899   :  { %1298 = vrot.lane.b32.xlu1 %v3209_v48, %s3054_s2 }
 0x907   :  { %v1130_v49 = vpop.xlane.xlu0 %1129 }
 0x908   :  { %v1134_v50 = vsub.f32 %v1072_v31, %v1130_v49 }
 0x909   :  { %v1133_v51 = vpop.xlane.xlu1 %1132 }
 0x90a   :  { %v1136_v52 = vmul.f32 1.442695, %v1134_v50  ;;  %v1135_v53 = vsub.f32 %v1122_v37, %v1133_v51 }
 0x90c   :  { %2882 = vpow2.f32 %v1136_v52  ;;  %v1138_v54 = vmul.f32 1.442695, %v1135_v53 }
 0x90d   :  { %v1201_v55 = vpop.permute.xlu1 %1200 }
 0x90e   :  { %2884 = vpow2.f32 %v1138_v54  ;;  %v1206_v56 = vsel %vm492_vm3, %v1201_v55, 0 }
 0x90f   :  { %2642 = vmatpush3.bf16.msra.mxu0 %v1206_v56 }
 0x910   :  { %2653 = vmatprep.subr.bf16.mxu0 %v3057_v23 }
 0x911   :  { %v1251_v2 = vpop.permute.xlu1 %1250 }
 0x912   :  { %v1256_v8 = vsel %vm371_vm1, %v1251_v2, 0 }
 0x915   :  { %v1301_v7 = vpop.permute.xlu1 %1300 }
 0x916   :  { %v2883_v57 = vpop.eup %2882  ;;  %v1306_v10 = vsel %vm371_vm1, %v1301_v7, 0 }
 0x917   :  { %v1140_v58 = vsel %vm464_vm2, %v2883_v57, 0.0 }
 0x918   :  { %v2885_v59 = vpop.eup %2884  ;;  %1141 = vadd.xlane.f32.xlu0 %v1140_v58 }
 0x919   :  { %v1143_v60 = vsel %vm464_vm2, %v2885_v59, 0.0  ;;  %v1299_v12 = vpop.permute.xlu1 %1298 }
 0x91c   :  { %1144 = vadd.xlane.f32.xlu0 %v1143_v60 }
 0x932   :  { %1152 = vrot.lane.b32.xlu0 %v3227_v18, %s3061_s16 }
 0x936   :  { %1248 = vrot.lane.b32.xlu0 %v3200_v45, %s3054_s2 }
 0x9a5   :  { %v1142_v61 = vpop.xlane.xlu0 %1141 }
 0x9a6   :  { %2886 = vrcp.f32 %v1142_v61 }
 0x9a9   :  { %v1145_v62 = vpop.xlane.xlu0 %1144 }
 0x9aa   :  { %2888 = vrcp.f32 %v1145_v62 }
 0x9ad   :  { %v1153_v63 = vpop.permute.xlu0 %1152 }
 0x9ae   :  { %v1158_v0 = vsel %vm492_vm3, %v1153_v63, 0 }
 0x9af   :  { %2636 = vmatpush3.bf16.msra.mxu1 %v1158_v0 }
 0x9b0   :  { %v2887_v1 = vpop.eup %2886  ;;  %2647 = vmatprep.subr.bf16.mxu1 %v3057_v23 }
 0x9b1   :  { %v1147_v3 = vmul.f32 %v2887_v1, %v2883_v57  ;;  %v1249_v11 = vpop.permute.xlu0 %1248 }
 0x9b3   :  { %v1150_v4 = vpack.c.bf16 %v1147_v3, %v1147_v3 }
 0x9b4   :  { %v2889_v5 = vpop.eup %2888 }
 0x9b5   :  { %v1149_v6 = vmul.f32 %v2889_v5, %v2885_v59  ;;  %2638 = vmatmul.mubr.msk.bf16.vlgmr.msra.gmra.mrb[28].mxu1 %vm464_vm2, %v1150_v4 }
 0x9b6   :  { %2649 = vmatprep.mubr.msk.bf16.mxu1 %vm3058_vm0, %v3057_v23 }
 0x9b7   :  { %v1151_v9 = vpack.c.bf16 %v1149_v6, %v1149_v6 }
 0x9b8   :  { %2648 = vmatpush3.bf16.xpose.msra.mxu1 %v1256_v8 }
 0x9b9   :  { %2644 = vmatmul.mubr.msk.bf16.vlgmr.msra.gmra.mrb[40].mxu0 %vm464_vm2, %v1151_v9  ;;  %2659 = vmatprep.subr.bf16.mxu1 %v3057_v23 }
 0x9ba   :  { %2654 = vmatpush3.bf16.xpose.msra.mxu0 %v1306_v10  ;;  %2655 = vmatprep.mubr.msk.bf16.mxu0 %vm3058_vm0, %v3057_v23 }
 0x9bb   :  { %2665 = vmatprep.subr.bf16.mxu0 %v3057_v23 }
 0x9bf   :  { %2650 = vmatmul.mubr.msk.bf16.vlgmr.msra.gmra.mrb[32].mxu1 %vm371_vm1, %v1249_v11 }
 0x9c0   :  { %2661 = vmatprep.mubr.msk.bf16.mxu1 %vm3058_vm0, %v3057_v23 }
 0x9c1   :  { %2656 = vmatmul.mubr.msk.bf16.vlgmr.msra.gmra.mrb[44].mxu0 %vm371_vm1, %v1299_v12 }
 0x9c2   :  { %2667 = vmatprep.mubr.msk.bf16.mxu0 %vm3058_vm0, %v3057_v23 }
 0xa88   :  { %v3381_v13 = vpop.f32.mrb[28].mxu1 }
 0xa89   :  { %v2639_v14 = vpop.f32.mrb[29].mxu1 }
 0xa8a   :  { %v1197_v15 = vpop.f32.mrb[30].mxu1 }
 0xa8b   :  { %v2640_v16 = vpop.f32.mrb[31].mxu1 }
 0xa8c   :  { %v3383_v17 = vpop.f32.mrb[40].mxu0 }
 0xa8d   :  { %v2793_v20 = vpack.i.bf16 %v3383_v17, %v3381_v13  ;;  %v2645_v21 = vpop.f32.mrb[41].mxu0 }
 0xa8e   :  { %v1245_v22 = vpop.f32.mrb[42].mxu0 }
 0xa8f   :  { %v2646_v27 = vpop.f32.mrb[43].mxu0 }
 0xa92   :  { %v1292_v28 = vpop.f32.mrb[32].mxu1 }
 0xa93   :  { %v2651_v30 = vpop.f32.mrb[33].mxu1  ;;  %v1348_v31 = vsel %vm464_vm2, %v1292_v28, -inf }
 0xa94   :  { %1349 = vmax.xlane.f32.xlu0 %v1348_v31  ;;  %v1295_v32 = vpop.f32.mrb[34].mxu1  ;;  %v1342_v35 = vpop.f32.mrb[44].mxu0 }
 0xa95   :  { %v2652_v36 = vpop.f32.mrb[35].mxu1  ;;  %v2657_v37 = vpop.f32.mrb[45].mxu0  ;;  %v1351_v38 = vsel %vm464_vm2, %v1342_v35, -inf }
 0xa96   :  { %1352 = vmax.xlane.f32.xlu1 %v1351_v38  ;;  %v1345_v39 = vpop.f32.mrb[46].mxu0 }
 0xa97   :  { %v2658_v43 = vpop.f32.mrb[47].mxu0 }
 0xaa7   :  { %1420 = vrot.lane.b32.xlu1 %v3232_v24, %s3054_s2 }
 0xaab   :  { %1470 = vrot.lane.b32.xlu1 %v3191_v40, %s3062_s19 }
 0xaaf   :  { %1520 = vrot.lane.b32.xlu1 %v3193_v42, %s3062_s19 }
 0xab3   :  { %1518 = vrot.lane.b32.xlu1 %v3209_v48, %s3062_s19 }
 0xb21   :  { %v1350_v44 = vpop.xlane.xlu0 %1349 }
 0xb22   :  { %v1354_v46 = vsub.f32 %v1292_v28, %v1350_v44 }
 0xb23   :  { %v1353_v49 = vpop.xlane.xlu1 %1352 }
 0xb24   :  { %v1356_v50 = vmul.f32 1.442695, %v1354_v46  ;;  %v1355_v51 = vsub.f32 %v1342_v35, %v1353_v49 }
 0xb26   :  { %2890 = vpow2.f32 %v1356_v50  ;;  %v1358_v52 = vmul.f32 1.442695, %v1355_v51 }
 0xb27   :  { %v1421_v53 = vpop.permute.xlu1 %1420 }
 0xb28   :  { %2892 = vpow2.f32 %v1358_v52  ;;  %v1426_v54 = vsel %vm492_vm3, %v1421_v53, 0 }
 0xb29   :  { %2666 = vmatpush3.bf16.msra.mxu0 %v1426_v54 }
 0xb2a   :  { %2677 = vmatprep.subr.bf16.mxu0 %v3057_v23 }
 0xb2b   :  { %v1471_v0 = vpop.permute.xlu1 %1470 }
 0xb2c   :  { %v1476_v6 = vsel %vm371_vm1, %v1471_v0, 0 }
 0xb2f   :  { %v1521_v5 = vpop.permute.xlu1 %1520 }
 0xb30   :  { %v2891_v55 = vpop.eup %2890  ;;  %v1526_v8 = vsel %vm371_vm1, %v1521_v5, 0 }
 0xb31   :  { %v1360_v56 = vsel %vm464_vm2, %v2891_v55, 0.0 }
 0xb32   :  { %v2893_v57 = vpop.eup %2892  ;;  %1361 = vadd.xlane.f32.xlu0 %v1360_v56 }
 0xb33   :  { %v1363_v58 = vsel %vm464_vm2, %v2893_v57, 0.0  ;;  %v1519_v10 = vpop.permute.xlu1 %1518 }
 0xb36   :  { %1364 = vadd.xlane.f32.xlu0 %v1363_v58 }
 0xb4c   :  { %1372 = vrot.lane.b32.xlu0 %v3227_v18, %s3054_s2 }
 0xb50   :  { %1468 = vrot.lane.b32.xlu0 %v3200_v45, %s3062_s19 }
 0xbbf   :  { %v1362_v59 = vpop.xlane.xlu0 %1361 }
 0xbc0   :  { %2894 = vrcp.f32 %v1362_v59 }
 0xbc3   :  { %v1365_v60 = vpop.xlane.xlu0 %1364 }
 0xbc4   :  { %2896 = vrcp.f32 %v1365_v60 }
 0xbc7   :  { %v1373_v61 = vpop.permute.xlu0 %1372 }
 0xbc8   :  { %v1378_v62 = vsel %vm492_vm3, %v1373_v61, 0 }
 0xbc9   :  { %2660 = vmatpush3.bf16.msra.mxu1 %v1378_v62 }
 0xbca   :  { %v2895_v63 = vpop.eup %2894  ;;  %2671 = vmatprep.subr.bf16.mxu1 %v3057_v23 }
 0xbcb   :  { %v1367_v1 = vmul.f32 %v2895_v63, %v2891_v55  ;;  %v1469_v9 = vpop.permute.xlu0 %1468 }
 0xbcd   :  { %v1370_v2 = vpack.c.bf16 %v1367_v1, %v1367_v1 }
 0xbce   :  { %v2897_v3 = vpop.eup %2896 }
 0xbcf   :  { %v1369_v4 = vmul.f32 %v2897_v3, %v2893_v57  ;;  %2662 = vmatmul.mubr.msk.bf16.vlgmr.msra.gmra.mrb[36].mxu1 %vm464_vm2, %v1370_v2 }
 0xbd0   :  { %2673 = vmatprep.mubr.msk.bf16.mxu1 %vm3058_vm0, %v3057_v23 }
 0xbd1   :  { %v1371_v7 = vpack.c.bf16 %v1369_v4, %v1369_v4 }
 0xbd2   :  { %2672 = vmatpush3.bf16.xpose.msra.mxu1 %v1476_v6 }
 0xbd3   :  { %2668 = vmatmul.mubr.msk.bf16.vlgmr.msra.gmra.mrb[48].mxu0 %vm464_vm2, %v1371_v7  ;;  %2683 = vmatprep.subr.bf16.mxu1 %v3057_v23 }
 0xbd4   :  { %2678 = vmatpush3.bf16.xpose.msra.mxu0 %v1526_v8  ;;  %2679 = vmatprep.mubr.msk.bf16.mxu0 %vm3058_vm0, %v3057_v23 }
 0xbd5   :  { %2689 = vmatprep.subr.bf16.mxu0 %v3057_v23 }
 0xbd9   :  { %2674 = vmatmul.mubr.msk.bf16.vlgmr.msra.gmra.mrb[40].mxu1 %vm371_vm1, %v1469_v9 }
 0xbda   :  { %2685 = vmatprep.mubr.msk.bf16.mxu1 %vm3058_vm0, %v3057_v23 }
 0xbdb   :  { %2680 = vmatmul.mubr.msk.bf16.vlgmr.msra.gmra.mrb[52].mxu0 %vm371_vm1, %v1519_v10 }
 0xbdc   :  { %2691 = vmatprep.mubr.msk.bf16.mxu0 %vm3058_vm0, %v3057_v23 }
 0xca2   :  { %v3423_v11 = vpop.f32.mrb[36].mxu1 }
 0xca3   :  { %v2663_v12 = vpop.f32.mrb[37].mxu1 }
 0xca4   :  { %v1417_v14 = vpop.f32.mrb[38].mxu1 }
 0xca5   :  { %v2664_v15 = vpop.f32.mrb[39].mxu1 }
 0xca6   :  { %v3425_v16 = vpop.f32.mrb[48].mxu0 }
 0xca7   :  { %v2798_v21 = vpack.i.bf16 %v3425_v16, %v3423_v11  ;;  %v2669_v22 = vpop.f32.mrb[49].mxu0 }
 0xca8   :  { %v1465_v27 = vpop.f32.mrb[50].mxu0 }
 0xca9   :  { %v2670_v28 = vpop.f32.mrb[51].mxu0 }
 0xcac   :  { %v1512_v30 = vpop.f32.mrb[40].mxu1 }
 0xcad   :  { %v2675_v31 = vpop.f32.mrb[41].mxu1  ;;  %v1568_v32 = vsel %vm464_vm2, %v1512_v30, -inf }
 0xcae   :  { %1569 = vmax.xlane.f32.xlu0 %v1568_v32  ;;  %v1515_v35 = vpop.f32.mrb[42].mxu1  ;;  %v1562_v36 = vpop.f32.mrb[52].mxu0 }
 0xcaf   :  { %v2676_v37 = vpop.f32.mrb[43].mxu1  ;;  %v2681_v38 = vpop.f32.mrb[53].mxu0  ;;  %v1571_v39 = vsel %vm464_vm2, %v1562_v36, -inf }
 0xcb0   :  { %1572 = vmax.xlane.f32.xlu1 %v1571_v39  ;;  %v1565_v43 = vpop.f32.mrb[54].mxu0 }
 0xcb1   :  { %v2682_v44 = vpop.f32.mrb[55].mxu0 }
 0xcc1   :  { %1640 = vrot.lane.b32.xlu1 %v3232_v24, %s3062_s19 }
 0xcc5   :  { %1690 = vrot.lane.b32.xlu1 %v3191_v40, %s3063_s20 }
 0xcc9   :  { %1740 = vrot.lane.b32.xlu1 %v3193_v42, %s3063_s20 }
 0xccd   :  { %1738 = vrot.lane.b32.xlu1 %v3209_v48, %s3063_s20 }
 0xd3b   :  { %v1570_v46 = vpop.xlane.xlu0 %1569 }
 0xd3c   :  { %v1574_v49 = vsub.f32 %v1512_v30, %v1570_v46 }
 0xd3d   :  { %v1573_v50 = vpop.xlane.xlu1 %1572 }
 0xd3e   :  { %v1576_v51 = vmul.f32 1.442695, %v1574_v49  ;;  %v1575_v52 = vsub.f32 %v1562_v36, %v1573_v50 }
 0xd40   :  { %2898 = vpow2.f32 %v1576_v51  ;;  %v1578_v53 = vmul.f32 1.442695, %v1575_v52 }
 0xd41   :  { %v1641_v54 = vpop.permute.xlu1 %1640 }
 0xd42   :  { %2900 = vpow2.f32 %v1578_v53  ;;  %v1646_v55 = vsel %vm492_vm3, %v1641_v54, 0 }
 0xd43   :  { %2690 = vmatpush3.bf16.msra.mxu0 %v1646_v55 }
 0xd44   :  { %2701 = vmatprep.subr.bf16.mxu0 %v3057_v23 }
 0xd45   :  { %v1691_v1 = vpop.permute.xlu1 %1690 }
 0xd46   :  { %v1696_v7 = vsel %vm371_vm1, %v1691_v1, 0 }
 0xd49   :  { %v1741_v6 = vpop.permute.xlu1 %1740 }
 0xd4a   :  { %v2899_v56 = vpop.eup %2898  ;;  %v1746_v9 = vsel %vm371_vm1, %v1741_v6, 0 }
 0xd4b   :  { %v1580_v57 = vsel %vm464_vm2, %v2899_v56, 0.0 }
 0xd4c   :  { %v2901_v58 = vpop.eup %2900  ;;  %1581 = vadd.xlane.f32.xlu0 %v1580_v57 }
 0xd4d   :  { %v1583_v59 = vsel %vm464_vm2, %v2901_v58, 0.0  ;;  %v1739_v12 = vpop.permute.xlu1 %1738 }
 0xd50   :  { %1584 = vadd.xlane.f32.xlu0 %v1583_v59 }
 0xd66   :  { %1592 = vrot.lane.b32.xlu0 %v3227_v18, %s3062_s19 }
 0xd6a   :  { %1688 = vrot.lane.b32.xlu0 %v3200_v45, %s3063_s20 }
 0xdd9   :  { %v1582_v60 = vpop.xlane.xlu0 %1581 }
 0xdda   :  { %2902 = vrcp.f32 %v1582_v60 }
 0xddd   :  { %v1585_v61 = vpop.xlane.xlu0 %1584 }
 0xdde   :  { %2904 = vrcp.f32 %v1585_v61 }
 0xde1   :  { %v1593_v62 = vpop.permute.xlu0 %1592 }
 0xde2   :  { %v1598_v63 = vsel %vm492_vm3, %v1593_v62, 0 }
 0xde3   :  { %2684 = vmatpush3.bf16.msra.mxu1 %v1598_v63 }
 0xde4   :  { %v2903_v0 = vpop.eup %2902  ;;  %2695 = vmatprep.subr.bf16.mxu1 %v3057_v23 }
 0xde5   :  { %v1587_v2 = vmul.f32 %v2903_v0, %v2899_v56  ;;  %v1689_v10 = vpop.permute.xlu0 %1688 }
 0xde7   :  { %v1590_v3 = vpack.c.bf16 %v1587_v2, %v1587_v2 }
 0xde8   :  { %v2905_v4 = vpop.eup %2904 }
 0xde9   :  { %v1589_v5 = vmul.f32 %v2905_v4, %v2901_v58  ;;  %2686 = vmatmul.mubr.msk.bf16.vlgmr.msra.gmra.mrb[44].mxu1 %vm464_vm2, %v1590_v3 }
 0xdea   :  { %2697 = vmatprep.mubr.msk.bf16.mxu1 %vm3058_vm0, %v3057_v23 }
 0xdeb   :  { %v1591_v8 = vpack.c.bf16 %v1589_v5, %v1589_v5 }
 0xdec   :  { %2696 = vmatpush3.bf16.xpose.msra.mxu1 %v1696_v7 }
 0xded   :  { %2692 = vmatmul.mubr.msk.bf16.vlgmr.msra.gmra.mrb[56].mxu0 %vm464_vm2, %v1591_v8  ;;  %2707 = vmatprep.subr.bf16.mxu1 %v3057_v23 }
 0xdee   :  { %2702 = vmatpush3.bf16.xpose.msra.mxu0 %v1746_v9  ;;  %2703 = vmatprep.mubr.msk.bf16.mxu0 %vm3058_vm0, %v3057_v23 }
 0xdef   :  { %2713 = vmatprep.subr.bf16.mxu0 %v3057_v23 }
 0xdf3   :  { %2698 = vmatmul.mubr.msk.bf16.vlgmr.msra.gmra.mrb[48].mxu1 %vm371_vm1, %v1689_v10 }
 0xdf4   :  { %2709 = vmatprep.mubr.msk.bf16.mxu1 %vm3058_vm0, %v3057_v23 }
 0xdf5   :  { %2704 = vmatmul.mubr.msk.bf16.vlgmr.msra.gmra.mrb[60].mxu0 %vm371_vm1, %v1739_v12 }
 0xdf6   :  { %2715 = vmatprep.mubr.msk.bf16.mxu0 %vm3058_vm0, %v3057_v23 }
 0xebc   :  { %v3465_v14 = vpop.f32.mrb[44].mxu1 }
 0xebd   :  { %v2687_v15 = vpop.f32.mrb[45].mxu1 }
 0xebe   :  { %v1637_v22 = vpop.f32.mrb[46].mxu1 }
 0xebf   :  { %v2688_v27 = vpop.f32.mrb[47].mxu1 }
 0xec0   :  { %v3467_v28 = vpop.f32.mrb[56].mxu0 }
 0xec1   :  { %v2803_v30 = vpack.i.bf16 %v3467_v28, %v3465_v14  ;;  %v2693_v31 = vpop.f32.mrb[57].mxu0  ;;  %v2850_v14 = vld [vmem:[#allocation8] sm:$0xff]   ;;  %v2851_v28 = vld [vmem:[#allocation8 + $0x8] sm:$0xff]  }
 0xec2   :  { %v1685_v32 = vpop.f32.mrb[58].mxu0 }
 0xec3   :  { %v2694_v35 = vpop.f32.mrb[59].mxu0 }
 0xec6   :  { %v1732_v36 = vpop.f32.mrb[48].mxu1 }
 0xec7   :  { %v2699_v37 = vpop.f32.mrb[49].mxu1  ;;  %v1788_v38 = vsel %vm464_vm2, %v1732_v36, -inf }
 0xec8   :  { %1789 = vmax.xlane.f32.xlu0 %v1788_v38  ;;  %v1735_v39 = vpop.f32.mrb[50].mxu1  ;;  %v1782_v43 = vpop.f32.mrb[60].mxu0 }
 0xec9   :  { %v2700_v44 = vpop.f32.mrb[51].mxu1  ;;  %v2705_v46 = vpop.f32.mrb[61].mxu0  ;;  %v1791_v49 = vsel %vm464_vm2, %v1782_v43, -inf }
 0xeca   :  { %1792 = vmax.xlane.f32.xlu1 %v1791_v49  ;;  %v1785_v50 = vpop.f32.mrb[62].mxu0 }
 0xecb   :  { %v2706_v51 = vpop.f32.mrb[63].mxu0 }
 0xedb   :  { %1860 = vrot.lane.b32.xlu1 %v3232_v24, %s3063_s20 }
 0xedf   :  { %1910 = vrot.lane.b32.xlu1 %v3191_v40, %s3064_s0 }
 0xee3   :  { %1960 = vrot.lane.b32.xlu1 %v3193_v42, %s3064_s0 }
 0xee7   :  { %1958 = vrot.lane.b32.xlu1 %v3209_v48, %s3064_s0 }
 0xf55   :  { %v1790_v52 = vpop.xlane.xlu0 %1789 }
 0xf56   :  { %v1794_v53 = vsub.f32 %v1732_v36, %v1790_v52 }
 0xf57   :  { %v1793_v54 = vpop.xlane.xlu1 %1792 }
 0xf58   :  { %v1796_v55 = vmul.f32 1.442695, %v1794_v53  ;;  %v1795_v56 = vsub.f32 %v1782_v43, %v1793_v54 }
 0xf5a   :  { %2906 = vpow2.f32 %v1796_v55  ;;  %v1798_v57 = vmul.f32 1.442695, %v1795_v56 }
 0xf5b   :  { %v1861_v58 = vpop.permute.xlu1 %1860 }
 0xf5c   :  { %2908 = vpow2.f32 %v1798_v57  ;;  %v1866_v59 = vsel %vm492_vm3, %v1861_v58, 0 }
 0xf5d   :  { %2714 = vmatpush3.bf16.msra.mxu0 %v1866_v59 }
 0xf5e   :  { %2725 = vmatprep.subr.bf16.mxu0 %v3057_v23 }
 0xf5f   :  { %v1911_v2 = vpop.permute.xlu1 %1910 }
 0xf63   :  { %v1961_v7 = vpop.permute.xlu1 %1960 }
 0xf64   :  { %v2907_v40 = vpop.eup %2906  ;;  %v1966_v9 = vsel %vm371_vm1, %v1961_v7, 0 }
 0xf65   :  { %v1800_v42 = vsel %vm464_vm2, %v2907_v40, 0.0 }
 0xf66   :  { %v2909_v60 = vpop.eup %2908  ;;  %1801 = vadd.xlane.f32.xlu0 %v1800_v42 }
 0xf67   :  { %v1803_v48 = vsel %vm464_vm2, %v2909_v60, 0.0  ;;  %v1959_v12 = vpop.permute.xlu1 %1958 }
 0xf6a   :  { %1804 = vadd.xlane.f32.xlu0 %v1803_v48  ;;  %v2853_v48 = vld [vmem:[#allocation8 + $0x18] sm:$0xff]  }
 0xf80   :  { %1812 = vrot.lane.b32.xlu0 %v3227_v18, %s3063_s20 }
 0xf84   :  { %1908 = vrot.lane.b32.xlu0 %v3200_v45, %s3064_s0  ;;  %v1916_v45 = vsel %vm371_vm1, %v1911_v2, 0 }
 0xff3   :  { %v1802_v61 = vpop.xlane.xlu0 %1801 }
 0xff4   :  { %2910 = vrcp.f32 %v1802_v61  ;;  %v2854_v61 = vld [vmem:[#allocation8 + $0x20] sm:$0xff]  }
 0xff7   :  { %v1805_v62 = vpop.xlane.xlu0 %1804 }
 0xff8   :  { %2912 = vrcp.f32 %v1805_v62  ;;  %v2855_v62 = vld [vmem:[#allocation8 + $0x28] sm:$0xff]  }
 0xffb   :  { %v1813_v63 = vpop.permute.xlu0 %1812 }
 0xffc   :  { %v1818_v0 = vsel %vm492_vm3, %v1813_v63, 0  ;;  %v2856_v63 = vld [vmem:[#allocation8 + $0x30] sm:$0xff]  }
 0xffd   :  { %2708 = vmatpush3.bf16.msra.mxu1 %v1818_v0  ;;  %v2857_v0 = vld [vmem:[#allocation8 + $0x38] sm:$0xff]  }
 0xffe   :  { %v2911_v1 = vpop.eup %2910  ;;  %2719 = vmatprep.subr.bf16.mxu1 %v3057_v23 }
 0xfff   :  { %v1807_v3 = vmul.f32 %v2911_v1, %v2907_v40  ;;  %v1909_v10 = vpop.permute.xlu0 %1908 }
0x1001   :  { %v1810_v4 = vpack.c.bf16 %v1807_v3, %v1807_v3 }
0x1002   :  { %v2913_v5 = vpop.eup %2912 }
0x1003   :  { %v1809_v6 = vmul.f32 %v2913_v5, %v2909_v60  ;;  %2710 = vmatmul.mubr.msk.bf16.vlgmr.msra.gmra.mrb[52].mxu1 %vm464_vm2, %v1810_v4 }
0x1004   :  { %2721 = vmatprep.mubr.msk.bf16.mxu1 %vm3058_vm0, %v3057_v23 }
0x1005   :  { %v1811_v8 = vpack.c.bf16 %v1809_v6, %v1809_v6 }
0x1006   :  { %2720 = vmatpush3.bf16.xpose.msra.mxu1 %v1916_v45 }
0x1007   :  { %2716 = vmatmul.mubr.msk.bf16.vlgmr.msra.gmra.mrb[64].mxu0 %vm464_vm2, %v1811_v8  ;;  %2731 = vmatprep.subr.bf16.mxu1 %v3057_v23 }
0x1008   :  { %2726 = vmatpush3.bf16.xpose.msra.mxu0 %v1966_v9  ;;  %2727 = vmatprep.mubr.msk.bf16.mxu0 %vm3058_vm0, %v3057_v23 }
0x1009   :  { %2737 = vmatprep.subr.bf16.mxu0 %v3057_v23 }
0x100d   :  { %2722 = vmatmul.mubr.msk.bf16.vlgmr.msra.gmra.mrb[56].mxu1 %vm371_vm1, %v1909_v10 }
0x100e   :  { %2733 = vmatprep.mubr.msk.bf16.mxu1 %vm3058_vm0, %v3057_v23 }
0x100f   :  { %2728 = vmatmul.mubr.msk.bf16.vlgmr.msra.gmra.mrb[68].mxu0 %vm371_vm1, %v1959_v12 }
0x1010   :  { %2739 = vmatprep.mubr.msk.bf16.mxu0 %vm3058_vm0, %v3057_v23 }
0x10d6   :  { %v1854_v15 = vpop.f32.mrb[52].mxu1 }
0x10d7   :  { %v2711_v22 = vpop.f32.mrb[53].mxu1 }
0x10d8   :  { %v1857_v27 = vpop.f32.mrb[54].mxu1 }
0x10d9   :  { %v2712_v31 = vpop.f32.mrb[55].mxu1 }
0x10da   :  { %v1902_v32 = vpop.f32.mrb[64].mxu0 }
0x10db   :  { %v2808_v35 = vpack.i.bf16 %v1902_v32, %v1854_v15  ;;  %v2717_v36 = vpop.f32.mrb[65].mxu0 }
0x10dc   :  { %v1905_v37 = vpop.f32.mrb[66].mxu0 }
0x10dd   :  { %v2718_v38 = vpop.f32.mrb[67].mxu0 }
0x10e0   :  { %v1952_v39 = vpop.f32.mrb[56].mxu1 }
0x10e1   :  { %v2723_v43 = vpop.f32.mrb[57].mxu1  ;;  %v2008_v44 = vsel %vm464_vm2, %v1952_v39, -inf }
0x10e2   :  { %2009 = vmax.xlane.f32.xlu0 %v2008_v44  ;;  %v1955_v46 = vpop.f32.mrb[58].mxu1  ;;  %v2002_v49 = vpop.f32.mrb[68].mxu0 }
0x10e3   :  { %v2724_v50 = vpop.f32.mrb[59].mxu1  ;;  %v2729_v51 = vpop.f32.mrb[69].mxu0  ;;  %v2011_v52 = vsel %vm464_vm2, %v2002_v49, -inf }
0x10e4   :  { %2012 = vmax.xlane.f32.xlu1 %v2011_v52  ;;  %v2005_v53 = vpop.f32.mrb[70].mxu0 }
0x10e5   :  { %v2730_v54 = vpop.f32.mrb[71].mxu0 }
0x10f5   :  { %2080 = vrot.lane.b32.xlu1 %v3232_v24, %s3064_s0 }
0x10f9   :  { %2784 = vrot.lane.b32.xlu1 %v2783_v34, %s3064_s0 }
0x10fd   :  { %2789 = vrot.lane.b32.xlu1 %v2788_v26, %s3063_s20 }
0x1101   :  { %2799 = vrot.lane.b32.xlu1 %v2798_v21, %s3054_s2 }
0x1105   :  { %2809 = vrot.lane.b32.xlu1 %v2808_v35, %s3060_s15 }
0x116f   :  { %v2010_v55 = vpop.xlane.xlu0 %2009 }
0x1170   :  { %v2014_v56 = vsub.f32 %v1952_v39, %v2010_v55 }
0x1171   :  { %v2013_v24 = vpop.xlane.xlu1 %2012 }
0x1172   :  { %v2016_v57 = vmul.f32 1.442695, %v2014_v56  ;;  %v2015_v58 = vsub.f32 %v2002_v49, %v2013_v24 }
0x1174   :  { %2914 = vpow2.f32 %v2016_v57  ;;  %v2018_v29 = vmul.f32 1.442695, %v2015_v58 }
0x1175   :  { %v2081_v33 = vpop.permute.xlu1 %2080 }
0x1176   :  { %2916 = vpow2.f32 %v2018_v29  ;;  %v2086_v34 = vsel %vm492_vm3, %v2081_v33, 0 }
0x1177   :  { %2738 = vmatpush3.bf16.msra.mxu0 %v2086_v34 }
0x1179   :  { %v2785_v9 = vpop.permute.xlu1 %2784 }
0x117a   :  { %v2787_v15 = vunpack.i.h.bf16 %v2785_v9  ;;  %v2786_v22 = vunpack.i.l.bf16 %v2785_v9  ;;  %v2447_v9 = vld [vmem:[%s3586_s7] ss:$0 sm:$0xff] }
0x117c   :  { %v2185_v37 = vsel %vm371_vm1, %v3259_v47, %v2787_v15  ;;  %v2184_v38 = vsel %vm371_vm1, %v3257_v41, %v2786_v22 }
0x117d   :  { %v2790_v10 = vpop.permute.xlu1 %2789 }
0x117e   :  { %v2915_v19 = vpop.eup %2914  ;;  %v2792_v27 = vunpack.i.h.bf16 %v2790_v10 }
0x117f   :  { %v2020_v25 = vsel %vm464_vm2, %v2915_v19, 0.0 }
0x1180   :  { %v2917_v26 = vpop.eup %2916  ;;  %2021 = vadd.xlane.f32.xlu0 %v2020_v25  ;;  %v2188_v43 = vsel %vm2186_vm4, %v2185_v37, %v2792_v27 }
0x1181   :  { %v2023_v11 = vsel %vm464_vm2, %v2917_v26, 0.0  ;;  %v2800_v31 = vpop.permute.xlu1 %2799 }
0x1182   :  { %v2802_v51 = vunpack.i.h.bf16 %v2800_v31  ;;  %v2801_v52 = vunpack.i.l.bf16 %v2800_v31 }
0x1184   :  { %2024 = vadd.xlane.f32.xlu0 %v2023_v11  ;;  %v2437_v11 = vld [vmem:[%s3584_s5] ss:$0 sm:$0xff] }
0x1185   :  { %v2810_v53 = vpop.permute.xlu1 %2809 }
0x1186   :  { %v2812_v47 = vunpack.i.h.bf16 %v2810_v53  ;;  %v2811_v57 = vunpack.i.l.bf16 %v2810_v53 }
0x119a   :  { %2032 = vrot.lane.b32.xlu0 %v3227_v18, %s3064_s0 }
0x119e   :  { %2794 = vrot.lane.b32.xlu0 %v2793_v20, %s3062_s19 }
0x11a2   :  { %2804 = vrot.lane.b32.xlu0 %v2803_v30, %s3061_s16  ;;  %v2852_v30 = vld [vmem:[#allocation8 + $0x10] sm:$0xff]  }
0x120d   :  { %v2022_v16 = vpop.xlane.xlu0 %2021 }
0x120e   :  { %2918 = vrcp.f32 %v2022_v16 }
0x1211   :  { %v2025_v21 = vpop.xlane.xlu0 %2024 }
0x1212   :  { %2920 = vrcp.f32 %v2025_v21 }
0x1215   :  { %v2033_v59 = vpop.permute.xlu0 %2032 }
0x1216   :  { %v2038_v40 = vsel %vm492_vm3, %v2033_v59, 0 }
0x1217   :  { %2732 = vmatpush3.bf16.msra.mxu1 %v2038_v40 }
0x1218   :  { %v2919_v42 = vpop.eup %2918  ;;  %2743 = vmatprep.subr.bf16.mxu1 %v3057_v23 }
0x1219   :  { %v2027_v18 = vmul.f32 %v2919_v42, %v2915_v19  ;;  %v2795_v12 = vpop.permute.xlu0 %2794 }
0x121a   :  { %v2797_v32 = vunpack.i.h.bf16 %v2795_v12  ;;  %v2796_v35 = vunpack.i.l.bf16 %v2795_v12 }
0x121b   :  { %v2030_v60 = vpack.c.bf16 %v2027_v18, %v2027_v18 }
0x121c   :  { %v2921_v13 = vpop.eup %2920  ;;  %v2191_v46 = vsel %vm2189_vm5, %v2188_v43, %v2797_v32 }
0x121d   :  { %v2029_v17 = vmul.f32 %v2921_v13, %v2917_v26  ;;  %2734 = vmatmul.mubr.msk.bf16.vlgmr.msra.gmra.mrb[60].mxu1 %vm464_vm2, %v2030_v60  ;;  %v2805_v36 = vpop.permute.xlu0 %2804  ;;  %v2194_v55 = vsel %vm2192_vm6, %v2191_v46, %v2802_v51  ;;  %v2926_v60 = vld [vmem:[#allocation2] sm:$0xff] }
0x121e   :  { %2759 = vmatprep.mubr.msk.bf16.mxu1 %vm3058_vm0, %v3057_v23  ;;  %2744 = vmatpush3.bf16.msra.mxu1 %v2850_v14  ;;  %v2807_v49 = vunpack.i.h.bf16 %v2805_v36  ;;  %v2806_v50 = vunpack.i.l.bf16 %v2805_v36 }
0x121f   :  { %v2031_v20 = vpack.c.bf16 %v2029_v17, %v2029_v17  ;;  %2745 = vmatprep.subr.bf16.mxu1 %v3057_v23  ;;  %v2927_v17 = vld [vmem:[#allocation2 + $0x8] sm:$0xff] }
0x1220   :  { %v2197_v24 = vsel %vm2195_vm7, %v2194_v55, %v2807_v49 }
0x1221   :  { %2740 = vmatmul.mubr.msk.bf16.vlgmr.msra.gmra.mrb[72].mxu0 %vm464_vm2, %v2031_v20  ;;  %v2200_v34 = vsel %vm2198_vm8, %v2197_v24, %v2812_v47 }
0x1222   :  { %2746 = vmatpush3.bf16.msra.mxu1 %v2851_v28 }
0x1223   :  { %2747 = vmatprep.subr.bf16.mxu1 %v3057_v23 }
0x1226   :  { %2748 = vmatpush3.bf16.msra.mxu1 %v2852_v30 }
0x1227   :  { %2749 = vmatprep.subr.bf16.mxu1 %v3057_v23 }
0x122a   :  { %2750 = vmatpush3.bf16.msra.mxu1 %v2853_v48 }
0x122b   :  { %2751 = vmatprep.subr.bf16.mxu1 %v3057_v23 }
0x122e   :  { %2752 = vmatpush3.bf16.msra.mxu1 %v2854_v61 }
0x122f   :  { %2753 = vmatprep.subr.bf16.mxu1 %v3057_v23 }
0x1232   :  { %2754 = vmatpush3.bf16.msra.mxu1 %v2855_v62 }
0x1233   :  { %2755 = vmatprep.subr.bf16.mxu1 %v3057_v23 }
0x1236   :  { %2756 = vmatpush3.bf16.msra.mxu1 %v2856_v63 }
0x1237   :  { %2757 = vmatprep.subr.bf16.mxu1 %v3057_v23  ;;  %v2791_v23 = vunpack.i.l.bf16 %v2790_v10 }
0x1239   :  { %v2187_v39 = vsel %vm2186_vm4, %v2184_v38, %v2791_v23 }
0x123a   :  { %2758 = vmatpush3.bf16.msra.mxu1 %v2857_v0  ;;  %v2190_v44 = vsel %vm2189_vm5, %v2187_v39, %v2796_v35 }
0x123b   :  { %v2193_v54 = vsel %vm2192_vm6, %v2190_v44, %v2801_v52 }
0x123c   :  { %v2196_v56 = vsel %vm2195_vm7, %v2193_v54, %v2806_v50 }
0x123d   :  { %v2199_v33 = vsel %vm2198_vm8, %v2196_v56, %v2811_v57 }
0x12f0   :  { %v2074_v1 = vpop.f32.mrb[60].mxu1 }
0x12f1   :  { %v2735_v2 = vpop.f32.mrb[61].mxu1 }
0x12f2   :  { %v2077_v3 = vpop.f32.mrb[62].mxu1 }
0x12f3   :  { %v2736_v4 = vpop.f32.mrb[63].mxu1 }
0x12f4   :  { %v2122_v5 = vpop.f32.mrb[72].mxu0 }
0x12f5   :  { %v2813_v6 = vpack.i.bf16 %v2122_v5, %v2074_v1  ;;  %v2741_v7 = vpop.f32.mrb[73].mxu0 }
0x12f6   :  { %v2125_v45 = vpop.f32.mrb[74].mxu0 }
0x12f7   :  { %2814 = vrot.lane.b32.xlu0 %v2813_v6, %s3059_s4  ;;  %v2742_v8 = vpop.f32.mrb[75].mxu0  ;;  %v2446_v45 = vld [vmem:[%s3585_s6] ss:$0 sm:$0xff] }
0x1369   :  { %v2815_v41 = vpop.permute.xlu0 %2814 }
0x136a   :  { %v2817_v58 = vunpack.i.h.bf16 %v2815_v41  ;;  %v2816_v29 = vunpack.i.l.bf16 %v2815_v41 }
0x136c   :  { %v2203_v19 = vsel %vm2201_vm9, %v2200_v34, %v2817_v58  ;;  %v2202_v25 = vsel %vm2201_vm9, %v2199_v33, %v2816_v29 }
0x136d   :  { %v2204_v26 = vpack.c.bf16 %v2203_v19, %v2202_v25 }
0x136f   :  { %2760 = vmatmul.mubr.bf16.vlgmr.msra.gmra.mrb[64].mxu1 %v2204_v26 }
0x1442   :  { %v2310_v16 = vpop.f32.mrb[64].mxu1 }
0x1443   :  { %v2311_v21 = vadd.f32 %v2437_v11, %v2310_v16  ;;  %v2761_v59 = vpop.f32.mrb[65].mxu1 }
0x1444   :  { %v2313_v40 = vpop.f32.mrb[66].mxu1 }
0x1445   :  { %v2314_v42 = vadd.f32 %v2437_v11, %v2313_v40  ;;  %v2762_v18 = vpop.f32.mrb[67].mxu1  ;;  %v2317_v13 = vadd.f32 %v2926_v60, %v2311_v21 }
0x1447   :  { %2319 = vadd.xlane.f32.xlu1 %v2317_v13  ;;  %v2318_v20 = vadd.f32 %v2927_v17, %v2314_v42 }
0x1449   :  { %2321 = vadd.xlane.f32.xlu0 %v2318_v20 }
0x14d4   :  { %v2320_v14 = vpop.xlane.xlu1 %2319 }
0x14d5   :  { %v2324_v28 = vmul.f32 0.0078125, %v2320_v14 }
0x14d6   :  { %v2322_v30 = vpop.xlane.xlu0 %2321 }
0x14d7   :  { %v2326_v48 = vsub.f32 %v2317_v13, %v2324_v28  ;;  %v2325_v61 = vmul.f32 0.0078125, %v2322_v30 }
0x14d9   :  { %v2327_v62 = vsub.f32 %v2318_v20, %v2325_v61  ;;  %v2328_v63 = vmul.f32 %v2326_v48, %v2326_v48 }
0x14db   :  { %2330 = vadd.xlane.f32.xlu0 %v2328_v63  ;;  %v2329_v0 = vmul.f32 %v2327_v62, %v2327_v62 }
0x14df   :  { %2332 = vadd.xlane.f32.xlu0 %v2329_v0 }
0x1568   :  { %v2331_v1 = vpop.xlane.xlu0 %2330 }
0x1569   :  { %v2334_v2 = vmul.f32 0.0078125, %v2331_v1 }
0x156b   :  { %v2336_v3 = vadd.f32 1e-05, %v2334_v2 }
0x156c   :  { %v2333_v4 = vpop.xlane.xlu0 %2332 }
0x156d   :  { %2922 = vrsqrt.f32 %v2336_v3  ;;  %v2335_v5 = vmul.f32 0.0078125, %v2333_v4 }
0x156f   :  { %v2337_v6 = vadd.f32 1e-05, %v2335_v5 }
0x1571   :  { %2924 = vrsqrt.f32 %v2337_v6 }
0x1577   :  { %v2923_v7 = vpop.eup %2922 }
0x1578   :  { %v2340_v8 = vmul.f32 %v2923_v7, %v2326_v48 }
0x157a   :  { %v2349_v10 = vmul.f32 %v2446_v45, %v2340_v8 }
0x157b   :  { %v2925_v12 = vpop.eup %2924 }
0x157c   :  { %v2341_v15 = vmul.f32 %v2925_v12, %v2327_v62  ;;  %v2358_v22 = vadd.f32 %v2447_v9, %v2349_v10 }
0x157e   :  { %v2350_v27 = vmul.f32 %v2446_v45, %v2341_v15  ;;  %2360 = vst [vmem:[#allocation10] sm:$0xff] %v2358_v22 }
0x1580   :  { %v2359_v23 = vadd.f32 %v2447_v9, %v2350_v27 }
0x1582   :  { %2361 = vst [vmem:[#allocation10 + $0x8] sm:$0xff] %v2359_v23 }
0x1583   :  { %3027 = shalt.err (!%p3024_p8)
}
0x1584   :  { %s3028_s29 = scalar_lea.hbm %s3587_s8, 256 }
0x1585   :  { %p3029_p9 = scmp.ne.s32.totalorder %s3587_s8, %s3028_s29  ;;  %p3032_p10 = scmp.lt.u32.totalorder %s3028_s29, %s3587_s8 }
0x1587   :  { %p3034_p11 = pnand %p3032_p10, %p3029_p9 }
0x1589   :  { %3037 = shalt.err (!%p3034_p11)
}
0x158a   :  { %2373 = dma.vmem_to_hbm [thread:$0]  %s2368_s26, 256, %s3587_s8, [#allocation4], %s3048_s17, %s3048_s17, %s3049_s18  }
0x158b   :  { %3044 = dma.done.wait [#allocation4], 256  }
0x158c   :  { %3045 = vsyncadd [#allocation4], 4294967040 }
0x158d   :  { %2377 = vsyncpa [#allocation3], 1 }
0x158e   :  { %2378 = vsyncpa [#allocation6], 1 }
0x158f   :  { %2379 = vsyncpa [#allocation9], 1 }
0x1590   :  { %2380 = vsyncpa [#allocation4], 1 }

</bundles_post_ra>
